<compile_context>
chip_gen: v7x
topology: tpu7x:2x2x1
jax: 0.10.0
libtpu: 0.0.40
codegen_flags: <defaults>
</compile_context>

<pallas_src>
import functools

import jax
import jax.numpy as jnp
from jax.experimental import pallas as pl
from jax.experimental.pallas import tpu as pltpu

_LANE = 128
_SUBLANE = 8


def _round_up(x, m):
    return ((x + m - 1) // m) * m


def _pad_axis_to(a, axis, target):
    pad = target - a.shape[axis]
    if pad == 0:
        return a
    widths = [(0, 0)] * a.ndim
    widths[axis] = (0, pad)
    return jnp.pad(a, widths)


def _resnet_kernel(x_ref, win_ref, bin_ref,
                   w1_ref, b1_ref, w2_ref, b2_ref,
                   wout_ref, bout_ref,
                   o_ref, h_ref, *, g):
    step = pl.program_id(1)
    wdt = w1_ref.dtype

    # First inner step of each batch tile: input projection -> f32 accumulator.
    @pl.when(step == 0)
    def _():
        x = x_ref[...].astype(win_ref.dtype)
        h_ref[...] = (jnp.dot(x, win_ref[...],
                              preferred_element_type=jnp.float32)
                      + bin_ref[...])

    # G residual MLP blocks per grid step (weights for these G blocks streamed
    # in as one DMA'd slab); statically unrolled, h carried in registers.
    h = h_ref[...]
    for j in range(g):
        z = (jnp.dot(h.astype(wdt), w1_ref[j],
                     preferred_element_type=jnp.float32)
             + b1_ref[j])
        z = jnp.maximum(z, 0.0)                        # ReLU; dropout1 = identity
        z = (jnp.dot(z.astype(wdt), w2_ref[j],
                     preferred_element_type=jnp.float32)
             + b2_ref[j])                               # dropout2 = identity
        h = h + z                                       # residual add
    h_ref[...] = h

    # Last inner step: output head (ReLU -> Linear).  Reuses the register copy
    # of h (no extra VMEM re-load); lane-dense store.
    @pl.when(step == pl.num_programs(1) - 1)
    def _():
        y = jnp.maximum(h, 0.0).astype(wout_ref.dtype)
        out = (jnp.dot(y, wout_ref[...],
                       preferred_element_type=jnp.float32)
               + bout_ref[...])
        o_ref[...] = out.astype(o_ref.dtype)


def resnet_nonorm_forward(x, params, *, tile_b=None,
                          weight_dtype=jnp.bfloat16, block_group=None):
    """ResNetNoNorm forward in one pallas_call.

    x: [B, d_in] float32
    params: dict with
      win  [d_in, d_block],   bin  [1, d_block]
      w1   [n_blocks, d_block, d_hidden],  b1 [n_blocks, d_hidden]
      w2   [n_blocks, d_hidden, d_block],  b2 [n_blocks, d_block]
      wout [d_block, d_out],  bout [1, d_out]
    weight_dtype: storage dtype of the weight matrices (default bf16);
      accumulation is always f32.
    block_group: residual blocks processed per grid step (default: auto).
    """
    B, d_in = x.shape
    d_block = params["win"].shape[1]
    n_blocks, _, d_hidden = params["w1"].shape
    d_out = params["wout"].shape[1]
    if n_blocks <= 0:
        raise ValueError("n_blocks must be > 0 (matches ResNetNoNorm assert)")

    wdt = jnp.dtype(weight_dtype)
    wbytes = wdt.itemsize
    xbytes = x.dtype.itemsize

    # --- pad feature dims to lane multiples (zero padding is exact) ---------
    d_in_p = _round_up(d_in, _LANE)
    d_block_p = _round_up(d_block, _LANE)
    d_hidden_p = _round_up(d_hidden, _LANE)
    d_out_p = _round_up(d_out, _LANE)

    # --- batch tile: 256 rows fills the v6e/v7x 2x256^2 MXU -----------------
    if tile_b is None:
        tile_b = 256 if B >= 256 else _round_up(max(B, 1), _SUBLANE)
    tile_b = _round_up(min(tile_b, _round_up(B, _SUBLANE)), _SUBLANE)
    B_p = _round_up(B, tile_b)
    n_batch_tiles = B_p // tile_b

    # --- residual-block grouping: amortize per-grid-step overhead -----------
    per_block_w_bytes = (d_block_p * d_hidden_p + d_hidden_p * d_block_p) * wbytes
    if block_group is None:
        # keep double-buffered streamed block weights under ~8 MiB
        G = max(1, (8 << 20) // max(2 * per_block_w_bytes, 1))
    else:
        G = max(1, int(block_group))
    G = min(G, n_blocks)
    n_steps = pl.cdiv(n_blocks, G)
    n_blocks_p = n_steps * G          # zero-padded blocks are exact identities

    # --- pad / cast parameters ----------------------------------------------
    x_p = _pad_axis_to(_pad_axis_to(x, 1, d_in_p), 0, B_p)

    win = _pad_axis_to(_pad_axis_to(params["win"], 0, d_in_p), 1, d_block_p).astype(wdt)
    wout = _pad_axis_to(_pad_axis_to(params["wout"], 0, d_block_p), 1, d_out_p).astype(wdt)
    w1 = _pad_axis_to(_pad_axis_to(_pad_axis_to(params["w1"], 1, d_block_p),
                                   2, d_hidden_p), 0, n_blocks_p).astype(wdt)
    w2 = _pad_axis_to(_pad_axis_to(_pad_axis_to(params["w2"], 1, d_hidden_p),
                                   2, d_block_p), 0, n_blocks_p).astype(wdt)

    bin_ = _pad_axis_to(params["bin"].reshape(1, d_block), 1, d_block_p).astype(jnp.float32)
    bout = _pad_axis_to(params["bout"].reshape(1, d_out), 1, d_out_p).astype(jnp.float32)
    b1 = _pad_axis_to(_pad_axis_to(params["b1"].reshape(n_blocks, 1, d_hidden),
                                   2, d_hidden_p), 0, n_blocks_p).astype(jnp.float32)
    b2 = _pad_axis_to(_pad_axis_to(params["b2"].reshape(n_blocks, 1, d_block),
                                   2, d_block_p), 0, n_blocks_p).astype(jnp.float32)

    inputs = (x_p, win, bin_, w1, b1, w2, b2, wout, bout)
    grid = (n_batch_tiles, n_steps)
    const_map = lambda i, k: (0, 0)

    # --- VMEM budget: explicit scoped limit, generation-aware ---------------
    try:
        phys_vmem = int(pltpu.get_tpu_info().vmem_capacity_bytes)
    except Exception:
        phys_vmem = 64 << 20  # conservative (v7x per-TC)
    est = 2 * (tile_b * d_in_p * xbytes                                  # x tile
               + d_in_p * d_block_p * wbytes + d_block_p * 4             # win, bin
               + G * (d_block_p * d_hidden_p + d_hidden_p * d_block_p) * wbytes
               + G * (d_hidden_p + d_block_p) * 4                        # b1, b2
               + d_block_p * d_out_p * wbytes + d_out_p * 4              # wout, bout
               + tile_b * d_out_p * xbytes)                              # out tile
    est += tile_b * d_block_p * 4                                        # h scratch
    est += 2 * tile_b * max(d_hidden_p, d_block_p) * 4                   # z working set
    vmem_limit_bytes = int(min(int(phys_vmem * 0.85), max(32 << 20, 2 * est)))

    # --- advisory cost estimate (counts per-batch-tile weight re-streaming) -
    flops = 2 * B_p * (d_in_p * d_block_p
                       + n_blocks_p * (d_block_p * d_hidden_p + d_hidden_p * d_block_p)
                       + d_block_p * d_out_p)
    streamed = n_batch_tiles * (w1.size * wbytes + w2.size * wbytes
                                + b1.size * 4 + b2.size * 4)
    fetched_once = (win.size * wbytes + wout.size * wbytes
                    + bin_.size * 4 + bout.size * 4)
    bytes_accessed = int(x_p.size * xbytes + B_p * d_out_p * xbytes
                         + streamed + fetched_once)

    kernel = functools.partial(_resnet_kernel, g=G)

    out_p = pl.pallas_call(
        kernel,
        out_shape=jax.ShapeDtypeStruct((B_p, d_out_p), x.dtype),
        grid_spec=pltpu.PrefetchScalarGridSpec(
            num_scalar_prefetch=0,
            grid=grid,
            in_specs=[
                # x: one batch tile; block index constant over axis 1 (no re-DMA).
                pl.BlockSpec((tile_b, d_in_p), lambda i, k: (i, 0)),
                pl.BlockSpec((d_in_p, d_block_p), const_map),       # win
                pl.BlockSpec((1, d_block_p), const_map),            # bin
                # G residual blocks' weights streamed per inner grid step.
                pl.BlockSpec((G, d_block_p, d_hidden_p), lambda i, k: (k, 0, 0)),
                pl.BlockSpec((G, 1, d_hidden_p), lambda i, k: (k, 0, 0)),
                pl.BlockSpec((G, d_hidden_p, d_block_p), lambda i, k: (k, 0, 0)),
                pl.BlockSpec((G, 1, d_block_p), lambda i, k: (k, 0, 0)),
                pl.BlockSpec((d_block_p, d_out_p), const_map),      # wout
                pl.BlockSpec((1, d_out_p), const_map),              # bout
            ],
            out_specs=pl.BlockSpec((tile_b, d_out_p), lambda i, k: (i, 0)),
            scratch_shapes=[pltpu.VMEM((tile_b, d_block_p), jnp.float32)],
        ),
        compiler_params=pltpu.CompilerParams(
            dimension_semantics=("parallel", "arbitrary"),
            vmem_limit_bytes=vmem_limit_bytes),
        cost_estimate=pl.CostEstimate(
            flops=flops, transcendentals=0, bytes_accessed=bytes_accessed),
    )(*inputs)

    return out_p[:B, :d_out]


def init_params(key, *, d_in, d_block, d_hidden, d_out, n_blocks):
    """Deterministic synthetic parameter init (shapes match the nn.Module)."""
    ks = jax.random.split(key, 8)
    s = 0.1
    return {
        "win":  s * jax.random.normal(ks[0], (d_in, d_block), jnp.float32),
        "bin":  s * jax.random.normal(ks[1], (1, d_block), jnp.float32),
        "w1":   s * jax.random.normal(ks[2], (n_blocks, d_block, d_hidden), jnp.float32),
        "b1":   s * jax.random.normal(ks[3], (n_blocks, d_hidden), jnp.float32),
        "w2":   s * jax.random.normal(ks[4], (n_blocks, d_hidden, d_block), jnp.float32),
        "b2":   s * jax.random.normal(ks[5], (n_blocks, d_block), jnp.float32),
        "wout": s * jax.random.normal(ks[6], (d_block, d_out), jnp.float32),
        "bout": s * jax.random.normal(ks[7], (1, d_out), jnp.float32),
    }


def reference_forward(x, params):
    """Pure-JAX reference mirroring the PyTorch forward (eval mode)."""
    h = x @ params["win"] + params["bin"]
    n_blocks = params["w1"].shape[0]
    for i in range(n_blocks):
        z = jnp.maximum(h @ params["w1"][i] + params["b1"][i], 0.0)
        z = z @ params["w2"][i] + params["b2"][i]
        h = h + z
    y = jnp.maximum(h, 0.0)
    return y @ params["wout"] + params["bout"]


if __name__ == "__main__":
    # ResNetNoNorm(d_in=32, d_out=16, n_blocks=3, d_block=64,
    #              d_hidden_multiplier=2.0, dropout1=0.0, dropout2=0.0)
    B, d_in, d_block, d_out, n_blocks = 256, 32, 64, 16, 3
    d_hidden = int(d_block * 2.0)

    key = jax.random.PRNGKey(0)
    kx, kp = jax.random.split(key)
    x = jax.random.normal(kx, (B, d_in), jnp.float32)
    params = init_params(kp, d_in=d_in, d_block=d_block,
                         d_hidden=d_hidden, d_out=d_out, n_blocks=n_blocks)

    ref = reference_forward(x, params)

    # f32-weight path: exactness check against the reference.
    out_f32 = jax.block_until_ready(
        resnet_nonorm_forward(x, params, weight_dtype=jnp.float32))
    assert out_f32.shape == (B, d_out)
    assert jnp.allclose(out_f32, ref, atol=1e-4, rtol=1e-4), "f32 mismatch vs reference"

    # Default path: bf16 weight/activation storage, f32 MXU accumulation.
    out = jax.block_until_ready(resnet_nonorm_forward(x, params))
    assert out.shape == (B, d_out)
    rel_err = float(jnp.max(jnp.abs(out - ref)) / (jnp.max(jnp.abs(ref)) + 1e-6))
    assert rel_err < 3e-2, f"bf16 relative error too large: {rel_err}"

    print("KERNEL_OK")
</pallas_src>

<mosaic_0001>
module attributes {stable_mosaic.version = 11 : i64} {
  func.func @_resnet_kernel(%arg0: i32, %arg1: i32, %arg2: memref<256x128xf32, #tpu.memory_space<vmem>>, %arg3: memref<128x128xf32, #tpu.memory_space<vmem>>, %arg4: memref<1x128xf32, #tpu.memory_space<vmem>>, %arg5: memref<3x128x128xf32, #tpu.memory_space<vmem>>, %arg6: memref<3x1x128xf32, #tpu.memory_space<vmem>>, %arg7: memref<3x128x128xf32, #tpu.memory_space<vmem>>, %arg8: memref<3x1x128xf32, #tpu.memory_space<vmem>>, %arg9: memref<128x128xf32, #tpu.memory_space<vmem>>, %arg10: memref<1x128xf32, #tpu.memory_space<vmem>>, %arg11: memref<256x128xf32, #tpu.memory_space<vmem>>, %arg12: memref<256x128xf32, #tpu.memory_space<vmem>>) attributes {dimension_semantics = [#tpu.dimension_semantics<parallel>, #tpu.dimension_semantics<arbitrary>], iteration_bounds = array<i64: 1, 1>, scalar_prefetch = 0 : i64, scratch_operands = 1 : i64, tpu.core_type = #tpu.core_type<tc>, window_params = [{transform_indices = @transform_0, window_bounds = array<i64: 256, 128>}, {pipeline_mode = #tpu.pipeline_mode<synchronous>, transform_indices = @transform_1, window_bounds = array<i64: 128, 128>}, {pipeline_mode = #tpu.pipeline_mode<synchronous>, transform_indices = @transform_2, window_bounds = array<i64: 1, 128>}, {transform_indices = @transform_3, window_bounds = array<i64: 3, 128, 128>}, {transform_indices = @transform_4, window_bounds = array<i64: 3, 1, 128>}, {transform_indices = @transform_5, window_bounds = array<i64: 3, 128, 128>}, {transform_indices = @transform_6, window_bounds = array<i64: 3, 1, 128>}, {pipeline_mode = #tpu.pipeline_mode<synchronous>, transform_indices = @transform_7, window_bounds = array<i64: 128, 128>}, {pipeline_mode = #tpu.pipeline_mode<synchronous>, transform_indices = @transform_8, window_bounds = array<i64: 1, 128>}, {transform_indices = @transform_9, window_bounds = array<i64: 256, 128>}]} {
    %c0_i32 = arith.constant 0 : i32
    %0 = arith.cmpi eq, %arg1, %c0_i32 : i32
    %1 = arith.extui %0 : i1 to i32
    %c0_i32_0 = arith.constant 0 : i32
    %2 = arith.cmpi ne, %1, %c0_i32_0 : i32
    scf.if %2 {
      %c0_48 = arith.constant 0 : index
      %c0_49 = arith.constant 0 : index
      %59 = vector.load %arg2[%c0_48, %c0_49] : memref<256x128xf32, #tpu.memory_space<vmem>>, vector<256x128xf32>
      %c0_50 = arith.constant 0 : index
      %c0_51 = arith.constant 0 : index
      %60 = vector.load %arg3[%c0_50, %c0_51] : memref<128x128xf32, #tpu.memory_space<vmem>>, vector<128x128xf32>
      %cst_52 = arith.constant dense<0.000000e+00> : vector<256x128xf32>
      %61 = tpu.matmul %59, %60, %cst_52 {dimension_numbers = #tpu.dot_dimension_numbers<[1], [0], [0], [1], [0, 0, 1, 1], [], []>} : vector<256x128xf32>, vector<128x128xf32>, vector<256x128xf32> -> vector<256x128xf32>
      %c0_53 = arith.constant 0 : index
      %c0_54 = arith.constant 0 : index
      %62 = vector.load %arg4[%c0_53, %c0_54] : memref<1x128xf32, #tpu.memory_space<vmem>>, vector<1x128xf32>
      %63 = vector.broadcast %62 : vector<1x128xf32> to vector<256x128xf32>
      %64 = arith.addf %61, %63 : vector<256x128xf32>
      %c0_55 = arith.constant 0 : index
      %c0_56 = arith.constant 0 : index
      %65 = vector.load %arg12[%c0_55, %c0_56] : memref<256x128xf32, #tpu.memory_space<vmem>>, vector<256x128xf32>
      tpu.vector_store %arg12[%c0_55, %c0_56], %64 {strides = array<i32>} : memref<256x128xf32, #tpu.memory_space<vmem>>, vector<256x128xf32>,
    } else {
    }
    %c0 = arith.constant 0 : index
    %c0_1 = arith.constant 0 : index
    %3 = vector.load %arg12[%c0, %c0_1] : memref<256x128xf32, #tpu.memory_space<vmem>>, vector<256x128xf32>
    %c0_2 = arith.constant 0 : index
    %c0_3 = arith.constant 0 : index
    %c0_4 = arith.constant 0 : index
    %4 = vector.load %arg5[%c0_2, %c0_3, %c0_4] : memref<3x128x128xf32, #tpu.memory_space<vmem>>, vector<1x128x128xf32>
    %5 = vector.shape_cast %4 : vector<1x128x128xf32> to vector<128x128xf32>
    %cst = arith.constant dense<0.000000e+00> : vector<256x128xf32>
    %6 = tpu.matmul %3, %5, %cst {dimension_numbers = #tpu.dot_dimension_numbers<[1], [0], [0], [1], [0, 0, 1, 1], [], []>} : vector<256x128xf32>, vector<128x128xf32>, vector<256x128xf32> -> vector<256x128xf32>
    %c0_5 = arith.constant 0 : index
    %c0_6 = arith.constant 0 : index
    %c0_7 = arith.constant 0 : index
    %7 = vector.load %arg6[%c0_5, %c0_6, %c0_7] : memref<3x1x128xf32, #tpu.memory_space<vmem>>, vector<1x1x128xf32>
    %8 = vector.shape_cast %7 : vector<1x1x128xf32> to vector<1x128xf32>
    %9 = vector.broadcast %8 : vector<1x128xf32> to vector<256x128xf32>
    %10 = arith.addf %6, %9 : vector<256x128xf32>
    %cst_8 = arith.constant 0.000000e+00 : f32
    %11 = vector.broadcast %cst_8 : f32 to vector<256x128xf32>
    %12 = arith.maximumf %10, %11 : vector<256x128xf32>
    %c0_9 = arith.constant 0 : index
    %c0_10 = arith.constant 0 : index
    %c0_11 = arith.constant 0 : index
    %13 = vector.load %arg7[%c0_9, %c0_10, %c0_11] : memref<3x128x128xf32, #tpu.memory_space<vmem>>, vector<1x128x128xf32>
    %14 = vector.shape_cast %13 : vector<1x128x128xf32> to vector<128x128xf32>
    %cst_12 = arith.constant dense<0.000000e+00> : vector<256x128xf32>
    %15 = tpu.matmul %12, %14, %cst_12 {dimension_numbers = #tpu.dot_dimension_numbers<[1], [0], [0], [1], [0, 0, 1, 1], [], []>} : vector<256x128xf32>, vector<128x128xf32>, vector<256x128xf32> -> vector<256x128xf32>
    %c0_13 = arith.constant 0 : index
    %c0_14 = arith.constant 0 : index
    %c0_15 = arith.constant 0 : index
    %16 = vector.load %arg8[%c0_13, %c0_14, %c0_15] : memref<3x1x128xf32, #tpu.memory_space<vmem>>, vector<1x1x128xf32>
    %17 = vector.shape_cast %16 : vector<1x1x128xf32> to vector<1x128xf32>
    %18 = vector.broadcast %17 : vector<1x128xf32> to vector<256x128xf32>
    %19 = arith.addf %15, %18 : vector<256x128xf32>
    %20 = arith.addf %3, %19 : vector<256x128xf32>
    %c1 = arith.constant 1 : index
    %c0_16 = arith.constant 0 : index
    %c0_17 = arith.constant 0 : index
    %21 = vector.load %arg5[%c1, %c0_16, %c0_17] : memref<3x128x128xf32, #tpu.memory_space<vmem>>, vector<1x128x128xf32>
    %22 = vector.shape_cast %21 : vector<1x128x128xf32> to vector<128x128xf32>
    %cst_18 = arith.constant dense<0.000000e+00> : vector<256x128xf32>
    %23 = tpu.matmul %20, %22, %cst_18 {dimension_numbers = #tpu.dot_dimension_numbers<[1], [0], [0], [1], [0, 0, 1, 1], [], []>} : vector<256x128xf32>, vector<128x128xf32>, vector<256x128xf32> -> vector<256x128xf32>
    %c1_19 = arith.constant 1 : index
    %c0_20 = arith.constant 0 : index
    %c0_21 = arith.constant 0 : index
    %24 = vector.load %arg6[%c1_19, %c0_20, %c0_21] : memref<3x1x128xf32, #tpu.memory_space<vmem>>, vector<1x1x128xf32>
    %25 = vector.shape_cast %24 : vector<1x1x128xf32> to vector<1x128xf32>
    %26 = vector.broadcast %25 : vector<1x128xf32> to vector<256x128xf32>
    %27 = arith.addf %23, %26 : vector<256x128xf32>
    %cst_22 = arith.constant 0.000000e+00 : f32
    %28 = vector.broadcast %cst_22 : f32 to vector<256x128xf32>
    %29 = arith.maximumf %27, %28 : vector<256x128xf32>
    %c1_23 = arith.constant 1 : index
    %c0_24 = arith.constant 0 : index
    %c0_25 = arith.constant 0 : index
    %30 = vector.load %arg7[%c1_23, %c0_24, %c0_25] : memref<3x128x128xf32, #tpu.memory_space<vmem>>, vector<1x128x128xf32>
    %31 = vector.shape_cast %30 : vector<1x128x128xf32> to vector<128x128xf32>
    %cst_26 = arith.constant dense<0.000000e+00> : vector<256x128xf32>
    %32 = tpu.matmul %29, %31, %cst_26 {dimension_numbers = #tpu.dot_dimension_numbers<[1], [0], [0], [1], [0, 0, 1, 1], [], []>} : vector<256x128xf32>, vector<128x128xf32>, vector<256x128xf32> -> vector<256x128xf32>
    %c1_27 = arith.constant 1 : index
    %c0_28 = arith.constant 0 : index
    %c0_29 = arith.constant 0 : index
    %33 = vector.load %arg8[%c1_27, %c0_28, %c0_29] : memref<3x1x128xf32, #tpu.memory_space<vmem>>, vector<1x1x128xf32>
    %34 = vector.shape_cast %33 : vector<1x1x128xf32> to vector<1x128xf32>
    %35 = vector.broadcast %34 : vector<1x128xf32> to vector<256x128xf32>
    %36 = arith.addf %32, %35 : vector<256x128xf32>
    %37 = arith.addf %20, %36 : vector<256x128xf32>
    %c2 = arith.constant 2 : index
    %c0_30 = arith.constant 0 : index
    %c0_31 = arith.constant 0 : index
    %38 = vector.load %arg5[%c2, %c0_30, %c0_31] : memref<3x128x128xf32, #tpu.memory_space<vmem>>, vector<1x128x128xf32>
    %39 = vector.shape_cast %38 : vector<1x128x128xf32> to vector<128x128xf32>
    %cst_32 = arith.constant dense<0.000000e+00> : vector<256x128xf32>
    %40 = tpu.matmul %37, %39, %cst_32 {dimension_numbers = #tpu.dot_dimension_numbers<[1], [0], [0], [1], [0, 0, 1, 1], [], []>} : vector<256x128xf32>, vector<128x128xf32>, vector<256x128xf32> -> vector<256x128xf32>
    %c2_33 = arith.constant 2 : index
    %c0_34 = arith.constant 0 : index
    %c0_35 = arith.constant 0 : index
    %41 = vector.load %arg6[%c2_33, %c0_34, %c0_35] : memref<3x1x128xf32, #tpu.memory_space<vmem>>, vector<1x1x128xf32>
    %42 = vector.shape_cast %41 : vector<1x1x128xf32> to vector<1x128xf32>
    %43 = vector.broadcast %42 : vector<1x128xf32> to vector<256x128xf32>
    %44 = arith.addf %40, %43 : vector<256x128xf32>
    %cst_36 = arith.constant 0.000000e+00 : f32
    %45 = vector.broadcast %cst_36 : f32 to vector<256x128xf32>
    %46 = arith.maximumf %44, %45 : vector<256x128xf32>
    %c2_37 = arith.constant 2 : index
    %c0_38 = arith.constant 0 : index
    %c0_39 = arith.constant 0 : index
    %47 = vector.load %arg7[%c2_37, %c0_38, %c0_39] : memref<3x128x128xf32, #tpu.memory_space<vmem>>, vector<1x128x128xf32>
    %48 = vector.shape_cast %47 : vector<1x128x128xf32> to vector<128x128xf32>
    %cst_40 = arith.constant dense<0.000000e+00> : vector<256x128xf32>
    %49 = tpu.matmul %46, %48, %cst_40 {dimension_numbers = #tpu.dot_dimension_numbers<[1], [0], [0], [1], [0, 0, 1, 1], [], []>} : vector<256x128xf32>, vector<128x128xf32>, vector<256x128xf32> -> vector<256x128xf32>
    %c2_41 = arith.constant 2 : index
    %c0_42 = arith.constant 0 : index
    %c0_43 = arith.constant 0 : index
    %50 = vector.load %arg8[%c2_41, %c0_42, %c0_43] : memref<3x1x128xf32, #tpu.memory_space<vmem>>, vector<1x1x128xf32>
    %51 = vector.shape_cast %50 : vector<1x1x128xf32> to vector<1x128xf32>
    %52 = vector.broadcast %51 : vector<1x128xf32> to vector<256x128xf32>
    %53 = arith.addf %49, %52 : vector<256x128xf32>
    %54 = arith.addf %37, %53 : vector<256x128xf32>
    %c0_44 = arith.constant 0 : index
    %c0_45 = arith.constant 0 : index
    %55 = vector.load %arg12[%c0_44, %c0_45] : memref<256x128xf32, #tpu.memory_space<vmem>>, vector<256x128xf32>
    tpu.vector_store %arg12[%c0_44, %c0_45], %54 {strides = array<i32>} : memref<256x128xf32, #tpu.memory_space<vmem>>, vector<256x128xf32>,
    %c0_i32_46 = arith.constant 0 : i32
    %56 = arith.cmpi eq, %arg1, %c0_i32_46 : i32
    %57 = arith.extui %56 : i1 to i32
    %c0_i32_47 = arith.constant 0 : i32
    %58 = arith.cmpi ne, %57, %c0_i32_47 : i32
    scf.if %58 {
      %cst_48 = arith.constant 0.000000e+00 : f32
      %59 = vector.broadcast %cst_48 : f32 to vector<256x128xf32>
      %60 = arith.maximumf %54, %59 : vector<256x128xf32>
      %c0_49 = arith.constant 0 : index
      %c0_50 = arith.constant 0 : index
      %61 = vector.load %arg9[%c0_49, %c0_50] : memref<128x128xf32, #tpu.memory_space<vmem>>, vector<128x128xf32>
      %cst_51 = arith.constant dense<0.000000e+00> : vector<256x128xf32>
      %62 = tpu.matmul %60, %61, %cst_51 {dimension_numbers = #tpu.dot_dimension_numbers<[1], [0], [0], [1], [0, 0, 1, 1], [], []>} : vector<256x128xf32>, vector<128x128xf32>, vector<256x128xf32> -> vector<256x128xf32>
      %c0_52 = arith.constant 0 : index
      %c0_53 = arith.constant 0 : index
      %63 = vector.load %arg10[%c0_52, %c0_53] : memref<1x128xf32, #tpu.memory_space<vmem>>, vector<1x128xf32>
      %64 = vector.broadcast %63 : vector<1x128xf32> to vector<256x128xf32>
      %65 = arith.addf %62, %64 : vector<256x128xf32>
      %c0_54 = arith.constant 0 : index
      %c0_55 = arith.constant 0 : index
      %66 = vector.load %arg11[%c0_54, %c0_55] : memref<256x128xf32, #tpu.memory_space<vmem>>, vector<256x128xf32>
      tpu.vector_store %arg11[%c0_54, %c0_55], %65 {strides = array<i32>} : memref<256x128xf32, #tpu.memory_space<vmem>>, vector<256x128xf32>,
    } else {
    }
    return
  }
  func.func @transform_0(%arg0: i32, %arg1: i32) -> (i32, i32) {
    %c0_i32 = arith.constant 0 : i32
    %c0_i32_0 = arith.constant 0 : i32
    return %arg0, %c0_i32 : i32, i32
  }
  func.func @transform_1(%arg0: i32, %arg1: i32) -> (i32, i32) {
    %c0_i32 = arith.constant 0 : i32
    %c0_i32_0 = arith.constant 0 : i32
    %c0_i32_1 = arith.constant 0 : i32
    return %c0_i32, %c0_i32_0 : i32, i32
  }
  func.func @transform_2(%arg0: i32, %arg1: i32) -> (i32, i32) {
    %c0_i32 = arith.constant 0 : i32
    %c0_i32_0 = arith.constant 0 : i32
    %c0_i32_1 = arith.constant 0 : i32
    return %c0_i32, %c0_i32_0 : i32, i32
  }
  func.func @transform_3(%arg0: i32, %arg1: i32) -> (i32, i32, i32) {
    %c0_i32 = arith.constant 0 : i32
    %c0_i32_0 = arith.constant 0 : i32
    %c0_i32_1 = arith.constant 0 : i32
    return %arg1, %c0_i32, %c0_i32_0 : i32, i32, i32
  }
  func.func @transform_4(%arg0: i32, %arg1: i32) -> (i32, i32, i32) {
    %c0_i32 = arith.constant 0 : i32
    %c0_i32_0 = arith.constant 0 : i32
    %c0_i32_1 = arith.constant 0 : i32
    return %arg1, %c0_i32, %c0_i32_0 : i32, i32, i32
  }
  func.func @transform_5(%arg0: i32, %arg1: i32) -> (i32, i32, i32) {
    %c0_i32 = arith.constant 0 : i32
    %c0_i32_0 = arith.constant 0 : i32
    %c0_i32_1 = arith.constant 0 : i32
    return %arg1, %c0_i32, %c0_i32_0 : i32, i32, i32
  }
  func.func @transform_6(%arg0: i32, %arg1: i32) -> (i32, i32, i32) {
    %c0_i32 = arith.constant 0 : i32
    %c0_i32_0 = arith.constant 0 : i32
    %c0_i32_1 = arith.constant 0 : i32
    return %arg1, %c0_i32, %c0_i32_0 : i32, i32, i32
  }
  func.func @transform_7(%arg0: i32, %arg1: i32) -> (i32, i32) {
    %c0_i32 = arith.constant 0 : i32
    %c0_i32_0 = arith.constant 0 : i32
    %c0_i32_1 = arith.constant 0 : i32
    return %c0_i32, %c0_i32_0 : i32, i32
  }
  func.func @transform_8(%arg0: i32, %arg1: i32) -> (i32, i32) {
    %c0_i32 = arith.constant 0 : i32
    %c0_i32_0 = arith.constant 0 : i32
    %c0_i32_1 = arith.constant 0 : i32
    return %c0_i32, %c0_i32_0 : i32, i32
  }
  func.func @transform_9(%arg0: i32, %arg1: i32) -> (i32, i32) {
    %c0_i32 = arith.constant 0 : i32
    %c0_i32_0 = arith.constant 0 : i32
    return %arg0, %c0_i32 : i32, i32
  }
}

</mosaic_0001>

<bundles_post_ra>
// kernel: tpu_custom_call.1
= control target key start
LH: loop header
LB: loop body
LE: loop exit
PB: predicated region body
PF: predicated region fallthrough
CT: control target
= control target key end

     0   :  { %14 = vsyncpa [#allocation4], 0  ;;  %s4785_s0 = inlined_call_operand.hbm [shape: f32[256,128], index: 0, kind: input, shape index: {}]   ;;  %s4786_s1 = inlined_call_operand.hbm [shape: f32[128,128], index: 1, kind: input, shape index: {}]   ;;  %s4787_s2 = inlined_call_operand.vmem [shape: f32[1,128], index: 2, kind: input, shape index: {}]   ;;  %s4788_s3 = inlined_call_operand.hbm [shape: f32[3,128,128], index: 3, kind: input, shape index: {}]   ;;  %s4789_s4 = inlined_call_operand.vmem [shape: f32[3,1,128], index: 4, kind: input, shape index: {}]   ;;  %s4790_s5 = inlined_call_operand.hbm [shape: f32[3,128,128], index: 5, kind: input, shape index: {}]   ;;  %s4791_s6 = inlined_call_operand.vmem [shape: f32[3,1,128], index: 6, kind: input, shape index: {}]   ;;  %s4792_s7 = inlined_call_operand.hbm [shape: f32[128,128], index: 7, kind: input, shape index: {}]   ;;  %s4793_s8 = inlined_call_operand.vmem [shape: f32[1,128], index: 8, kind: input, shape index: {}]   ;;  %s4794_s9 = inlined_call_operand.hbm [shape: f32[256,128], index: 9, kind: output, shape index: {}]  }
   0x1   :  { %15 = vsyncpa [#allocation7], 0 }
   0x2   :  { %16 = vsyncpa [#allocation10], 0 }
   0x3   :  { %17 = vsyncpa [#allocation5], 0  ;;  %s3943_s30 = smov [#allocation6]   ;;  %s3944_s11 = smov [#allocation9]  }
   0x4   :  { %s35_s10 = sshll.u32 %s3943_s30, 4  ;;  %s63_s12 = sshll.u32 %s3944_s11, 4  ;;  %s36_s10 = int_to_ptr.vmem [resolvable:$true] %s35_s10  ;;  %s4001_s12 = int_to_ptr.vmem [resolvable:$true] %s63_s12 }
   0x5   :  { %s3803_s15 = scalar_lea.hbm %s4786_s1, 2048 }
   0x6   :  { %p3804_p0 = scmp.ne.s32.totalorder %s4786_s1, %s3803_s15  ;;  %p3807_p1 = scmp.lt.u32.totalorder %s3803_s15, %s4786_s1 }
   0x8   :  { %p3809_p2 = pnand %p3807_p1, %p3804_p0 }
   0xa   :  { %3812 = shalt.err (!%p3809_p2)
}
   0xb   :  { %s3813_s20 = scalar_lea.vmem %s36_s10, 2048  ;;  %p3818_p4 = scmp.lt.s32.totalorder %s36_s10, %s36_s10 }
   0xc   :  { %p3814_p3 = scmp.ne.s32.totalorder %s36_s10, %s3813_s20  ;;  %p3819_p5 = scmp.lt.s32.totalorder %s3813_s20, %s3813_s20 }
   0xe   :  { %p3820_p6 = por %p3819_p5, %p3818_p4 }
  0x10   :  { %p3821_p7 = pnand %p3820_p6, %p3814_p3 }
  0x12   :  { %3824 = shalt.err (!%p3821_p7)
}
  0x13   :  { %s3945_s21 = smov 128   ;;  %s3946_s22 = smov 8  }
  0x14   :  { %41 = dma.hbm_to_vmem [thread:$0]  %s4786_s1, 2048, %s36_s10, [#allocation7], %s3945_s21, %s3945_s21, %s3946_s22  }
  0x15   :  { %s3825_s27 = scalar_lea.hbm %s4790_s5, 6144 }
  0x16   :  { %p3826_p8 = scmp.ne.s32.totalorder %s4790_s5, %s3825_s27  ;;  %p3829_p9 = scmp.lt.u32.totalorder %s3825_s27, %s4790_s5 }
  0x18   :  { %p3831_p10 = pnand %p3829_p9, %p3826_p8 }
  0x1a   :  { %3834 = shalt.err (!%p3831_p10)
}
  0x1b   :  { %s3835_s13 = scalar_lea.vmem %s4001_s12, 6144  ;;  %p3840_p12 = scmp.lt.s32.totalorder %s4001_s12, %s4001_s12 }
  0x1c   :  { %p3836_p11 = scmp.ne.s32.totalorder %s4001_s12, %s3835_s13  ;;  %p3841_p13 = scmp.lt.s32.totalorder %s3835_s13, %s3835_s13 }
  0x1e   :  { %p3842_p0 = por %p3841_p13, %p3840_p12 }
  0x20   :  { %p3843_p1 = pnand %p3842_p0, %p3836_p11 }
  0x22   :  { %3846 = shalt.err (!%p3843_p1)
}
  0x23   :  { %69 = dma.hbm_to_vmem [thread:$0]  %s4790_s5, 6144, %s4001_s12, [#allocation10], %s3945_s21, %s3945_s21, %s3946_s22  }
  0x24   :  { %s3947_s14 = smov [#allocation3]   ;;  %s3948_s16 = smov [#allocation8]  }
  0x25   :  { %s23_s15 = sshll.u32 %s3947_s14, 4  ;;  %s49_s17 = sshll.u32 %s3948_s16, 4  ;;  %s24_s15 = int_to_ptr.vmem [resolvable:$true] %s23_s15  ;;  %s4038_s17 = int_to_ptr.vmem [resolvable:$true] %s49_s17 }
  0x26   :  { %s3847_s20 = scalar_lea.hbm %s4785_s0, 4096 }
  0x27   :  { %p3848_p2 = scmp.ne.s32.totalorder %s4785_s0, %s3847_s20  ;;  %p3851_p3 = scmp.lt.u32.totalorder %s3847_s20, %s4785_s0 }
  0x29   :  { %p3853_p4 = pnand %p3851_p3, %p3848_p2 }
  0x2b   :  { %3856 = shalt.err (!%p3853_p4)
}
  0x2c   :  { %s3857_s5 = scalar_lea.vmem %s24_s15, 4096  ;;  %p3862_p6 = scmp.lt.s32.totalorder %s24_s15, %s24_s15 }
  0x2d   :  { %p3858_p5 = scmp.ne.s32.totalorder %s24_s15, %s3857_s5  ;;  %p3863_p7 = scmp.lt.s32.totalorder %s3857_s5, %s3857_s5 }
  0x2f   :  { %p3864_p8 = por %p3863_p7, %p3862_p6 }
  0x31   :  { %p3865_p9 = pnand %p3864_p8, %p3858_p5 }
  0x33   :  { %3868 = shalt.err (!%p3865_p9)
}
  0x34   :  { %29 = dma.hbm_to_vmem [thread:$0]  %s4785_s0, 4096, %s24_s15, [#allocation4], %s3945_s21, %s3945_s21, %s3946_s22  }
  0x35   :  { %s3869_s30 = scalar_lea.hbm %s4788_s3, 6144 }
  0x36   :  { %p3870_p10 = scmp.ne.s32.totalorder %s4788_s3, %s3869_s30  ;;  %p3873_p11 = scmp.lt.u32.totalorder %s3869_s30, %s4788_s3 }
  0x38   :  { %p3875_p12 = pnand %p3873_p11, %p3870_p10 }
  0x3a   :  { %3878 = shalt.err (!%p3875_p12)
}
  0x3b   :  { %s3879_s14 = scalar_lea.vmem %s4038_s17, 6144  ;;  %p3884_p0 = scmp.lt.s32.totalorder %s4038_s17, %s4038_s17 }
  0x3c   :  { %p3880_p13 = scmp.ne.s32.totalorder %s4038_s17, %s3879_s14  ;;  %p3885_p1 = scmp.lt.s32.totalorder %s3879_s14, %s3879_s14 }
  0x3e   :  { %p3886_p2 = por %p3885_p1, %p3884_p0 }
  0x40   :  { %p3887_p3 = pnand %p3886_p2, %p3880_p13 }
  0x42   :  { %3890 = shalt.err (!%p3887_p3)
}
  0x43   :  { %55 = dma.hbm_to_vmem [thread:$0]  %s4788_s3, 6144, %s4038_s17, [#allocation7], %s3945_s21, %s3945_s21, %s3946_s22  }
  0x44   :  { %s3949_s16 = smov [#allocation11]   ;;  %s3891_s23 = scalar_lea.hbm %s4792_s7, 2048 }
  0x45   :  { %s77_s18 = sshll.u32 %s3949_s16, 4  ;;  %p3892_p4 = scmp.ne.s32.totalorder %s4792_s7, %s3891_s23  ;;  %s78_s18 = int_to_ptr.vmem [resolvable:$true] %s77_s18 }
  0x46   :  { %p3895_p5 = scmp.lt.u32.totalorder %s3891_s23, %s4792_s7 }
  0x48   :  { %p3897_p6 = pnand %p3895_p5, %p3892_p4 }
  0x4a   :  { %3900 = shalt.err (!%p3897_p6)
}
  0x4b   :  { %s3901_s12 = scalar_lea.vmem %s78_s18, 2048  ;;  %p3906_p8 = scmp.lt.s32.totalorder %s78_s18, %s78_s18 }
  0x4c   :  { %p3902_p7 = scmp.ne.s32.totalorder %s78_s18, %s3901_s12  ;;  %p3907_p9 = scmp.lt.s32.totalorder %s3901_s12, %s3901_s12 }
  0x4e   :  { %p3908_p10 = por %p3907_p9, %p3906_p8 }
  0x50   :  { %p3909_p11 = pnand %p3908_p10, %p3902_p7 }
  0x52   :  { %3912 = shalt.err (!%p3909_p11)
}
  0x53   :  { %83 = dma.hbm_to_vmem [thread:$0]  %s4792_s7, 2048, %s78_s18, [#allocation10], %s3945_s21, %s3945_s21, %s3946_s22  }
  0x54   :  { %3935 = dma.done.wait [#allocation4], 4096  }
  0x55   :  { %3936 = vsyncadd [#allocation4], 4294963200 }
  0x56   :  { %3937 = dma.done.wait [#allocation7], 8192  }
  0x57   :  { %3938 = vsyncadd [#allocation7], 4294959104 }
  0x58   :  { %3939 = dma.done.wait [#allocation10], 8192  }
  0x59   :  { %3940 = vsyncadd [#allocation10], 4294959104  ;;  %v137_v0 = vld [vmem:[#allocation6] sm:$0xff]  ;;  %v138_v1 = vld [vmem:[#allocation6 + $0x8] sm:$0xff] }
  0x5a   :  { %v139_v2 = vld [vmem:[#allocation6 + $0x10] sm:$0xff]  ;;  %v3539_v3 = vpack.c.bf16 %v138_v1, %v137_v0  ;;  %v140_v4 = vld [vmem:[#allocation6 + $0x18] sm:$0xff]  ;;  %v141_v6 = vld [vmem:[#allocation6 + $0x20] sm:$0xff] }
  0x5b   :  { %v3543_v5 = vpack.c.bf16 %v140_v4, %v139_v2  ;;  %v142_v7 = vld [vmem:[#allocation6 + $0x28] sm:$0xff]  ;;  %v105_v9 = vld [vmem:[#allocation3] sm:$0xff]  ;;  %v143_v10 = vld [vmem:[#allocation6 + $0x30] sm:$0xff] }
  0x5c   :  { %3540 = vmatprep.subr.bf16.mxu0 %v3539_v3  ;;  %v3547_v8 = vpack.c.bf16 %v142_v7, %v141_v6  ;;  %v144_v11 = vld [vmem:[#allocation6 + $0x38] sm:$0xff]  ;;  %2931 = vmatprep.mubr.f32.mxu0 %v105_v9  ;;  %v145_v13 = vld [vmem:[#allocation6 + $0x40] sm:$0xff]  ;;  %v146_v14 = vld [vmem:[#allocation6 + $0x48] sm:$0xff] }
  0x5d   :  { %3542 = vmatpush3.bf16.msra.mxu0 %v3539_v3  ;;  %v3551_v12 = vpack.c.bf16 %v144_v11, %v143_v10  ;;  %v3555_v15 = vpack.c.bf16 %v146_v14, %v145_v13  ;;  %v147_v16 = vld [vmem:[#allocation6 + $0x50] sm:$0xff]  ;;  %v148_v17 = vld [vmem:[#allocation6 + $0x58] sm:$0xff]  ;;  %v449_v18 = vld [vmem:[#allocation8] sm:$0xff] }
  0x5e   :  { %3544 = vmatprep.subr.bf16.mxu0 %v3543_v5  ;;  %v450_v19 = vld [vmem:[#allocation8 + $0x8] sm:$0xff]  ;;  %v451_v20 = vld [vmem:[#allocation8 + $0x10] sm:$0xff]  ;;  %v3559_v21 = vpack.c.bf16 %v148_v17, %v147_v16  ;;  %v149_v22 = vld [vmem:[#allocation6 + $0x60] sm:$0xff] }
  0x5f   :  { %v3571_v23 = vpack.c.bf16 %v450_v19, %v449_v18  ;;  %v452_v24 = vld [vmem:[#allocation8 + $0x18] sm:$0xff]  ;;  %v150_v25 = vld [vmem:[#allocation6 + $0x68] sm:$0xff]  ;;  %v453_v27 = vld [vmem:[#allocation8 + $0x20] sm:$0xff] }
  0x60   :  { %v3575_v26 = vpack.c.bf16 %v452_v24, %v451_v20  ;;  %v454_v28 = vld [vmem:[#allocation8 + $0x28] sm:$0xff]  ;;  %v3563_v29 = vpack.c.bf16 %v150_v25, %v149_v22  ;;  %v151_v30 = vld [vmem:[#allocation6 + $0x70] sm:$0xff]  ;;  %v152_v32 = vld [vmem:[#allocation6 + $0x78] sm:$0xff] }
  0x61   :  { %3546 = vmatpush3.bf16.msra.mxu0 %v3543_v5  ;;  %3572 = vmatprep.subr.bf16.mxu1 %v3571_v23  ;;  %v3579_v31 = vpack.c.bf16 %v454_v28, %v453_v27  ;;  %v455_v33 = vld [vmem:[#allocation8 + $0x30] sm:$0xff]  ;;  %v456_v34 = vld [vmem:[#allocation8 + $0x38] sm:$0xff]  ;;  %v3567_v35 = vpack.c.bf16 %v152_v32, %v151_v30  ;;  %v457_v37 = vld [vmem:[#allocation8 + $0x40] sm:$0xff] }
  0x62   :  { %3548 = vmatprep.subr.bf16.mxu0 %v3547_v8  ;;  %3574 = vmatpush3.bf16.msra.mxu1 %v3571_v23  ;;  %v3583_v36 = vpack.c.bf16 %v456_v34, %v455_v33  ;;  %v458_v38 = vld [vmem:[#allocation8 + $0x48] sm:$0xff]  ;;  %v459_v40 = vld [vmem:[#allocation8 + $0x50] sm:$0xff]  ;;  %v460_v41 = vld [vmem:[#allocation8 + $0x58] sm:$0xff] }
  0x63   :  { %3576 = vmatprep.subr.bf16.mxu1 %v3575_v26  ;;  %v3587_v39 = vpack.c.bf16 %v458_v38, %v457_v37  ;;  %v106_v42 = vld [vmem:[#allocation3 + $0x8] sm:$0xff]  ;;  %v107_v43 = vld [vmem:[#allocation3 + $0x10] sm:$0xff]  ;;  %v3591_v44 = vpack.c.bf16 %v460_v41, %v459_v40  ;;  %v461_v45 = vld [vmem:[#allocation8 + $0x60] sm:$0xff] }
  0x64   :  { %v462_v46 = vld [vmem:[#allocation8 + $0x68] sm:$0xff]  ;;  %v108_v47 = vld [vmem:[#allocation3 + $0x18] sm:$0xff]  ;;  %v109_v48 = vld [vmem:[#allocation3 + $0x20] sm:$0xff] }
  0x65   :  { %3550 = vmatpush3.bf16.msra.mxu0 %v3547_v8  ;;  %v3595_v49 = vpack.c.bf16 %v462_v46, %v461_v45  ;;  %v110_v50 = vld [vmem:[#allocation3 + $0x28] sm:$0xff]  ;;  %v111_v51 = vld [vmem:[#allocation3 + $0x30] sm:$0xff]  ;;  %v112_v52 = vld [vmem:[#allocation3 + $0x38] sm:$0xff] }
  0x66   :  { %3552 = vmatprep.subr.bf16.mxu0 %v3551_v12  ;;  %3578 = vmatpush3.bf16.msra.mxu1 %v3575_v26  ;;  %v113_v53 = vld [vmem:[#allocation3 + $0x40] sm:$0xff]  ;;  %v114_v54 = vld [vmem:[#allocation3 + $0x48] sm:$0xff]  ;;  %v115_v55 = vld [vmem:[#allocation3 + $0x50] sm:$0xff] }
  0x67   :  { %3580 = vmatprep.subr.bf16.mxu1 %v3579_v31  ;;  %v116_v56 = vld [vmem:[#allocation3 + $0x58] sm:$0xff]  ;;  %v117_v57 = vld [vmem:[#allocation3 + $0x60] sm:$0xff]  ;;  %v118_v58 = vld [vmem:[#allocation3 + $0x68] sm:$0xff] }
  0x68   :  { %v119_v59 = vld [vmem:[#allocation3 + $0x70] sm:$0xff]  ;;  %v120_v60 = vld [vmem:[#allocation3 + $0x78] sm:$0xff]  ;;  %v121_v61 = vld [vmem:[#allocation3 + $0x80] sm:$0xff] }
  0x69   :  { %3554 = vmatpush3.bf16.msra.mxu0 %v3551_v12  ;;  %v122_v62 = vld [vmem:[#allocation3 + $0x88] sm:$0xff]  ;;  %v123_v63 = vld [vmem:[#allocation3 + $0x90] sm:$0xff]  ;;  %v124_v0 = vld [vmem:[#allocation3 + $0x98] sm:$0xff] }
  0x6a   :  { %3556 = vmatprep.subr.bf16.mxu0 %v3555_v15  ;;  %3582 = vmatpush3.bf16.msra.mxu1 %v3579_v31  ;;  %v125_v1 = vld [vmem:[#allocation3 + $0xa0] sm:$0xff]  ;;  %v126_v2 = vld [vmem:[#allocation3 + $0xa8] sm:$0xff]  ;;  %v127_v3 = vld [vmem:[#allocation3 + $0xb0] sm:$0xff] }
  0x6b   :  { %3584 = vmatprep.subr.bf16.mxu1 %v3583_v36  ;;  %v128_v4 = vld [vmem:[#allocation3 + $0xb8] sm:$0xff]  ;;  %v129_v5 = vld [vmem:[#allocation3 + $0xc0] sm:$0xff]  ;;  %v130_v6 = vld [vmem:[#allocation3 + $0xc8] sm:$0xff] }
  0x6c   :  { %v131_v7 = vld [vmem:[#allocation3 + $0xd0] sm:$0xff]  ;;  %v132_v8 = vld [vmem:[#allocation3 + $0xd8] sm:$0xff]  ;;  %v133_v9 = vld [vmem:[#allocation3 + $0xe0] sm:$0xff] }
  0x6d   :  { %3558 = vmatpush3.bf16.msra.mxu0 %v3555_v15  ;;  %v134_v10 = vld [vmem:[#allocation3 + $0xe8] sm:$0xff]  ;;  %v135_v11 = vld [vmem:[#allocation3 + $0xf0] sm:$0xff]  ;;  %v136_v12 = vld [vmem:[#allocation3 + $0xf8] sm:$0xff] }
  0x6e   :  { %3560 = vmatprep.subr.bf16.mxu0 %v3559_v21  ;;  %3586 = vmatpush3.bf16.msra.mxu1 %v3583_v36  ;;  %v463_v13 = vld [vmem:[#allocation8 + $0x70] sm:$0xff]  ;;  %v464_v14 = vld [vmem:[#allocation8 + $0x78] sm:$0xff]  ;;  %v729_v16 = vld [vmem:[#allocation9] sm:$0xff] }
  0x6f   :  { %3588 = vmatprep.subr.bf16.mxu1 %v3587_v39  ;;  %v3599_v15 = vpack.c.bf16 %v464_v14, %v463_v13  ;;  %v730_v17 = vld [vmem:[#allocation9 + $0x8] sm:$0xff]  ;;  %v731_v18 = vld [vmem:[#allocation9 + $0x10] sm:$0xff]  ;;  %v732_v20 = vld [vmem:[#allocation9 + $0x18] sm:$0xff] }
  0x70   :  { %v3603_v19 = vpack.c.bf16 %v730_v17, %v729_v16  ;;  %v733_v22 = vld [vmem:[#allocation9 + $0x20] sm:$0xff]  ;;  %v734_v23 = vld [vmem:[#allocation9 + $0x28] sm:$0xff]  ;;  %v735_v25 = vld [vmem:[#allocation9 + $0x30] sm:$0xff] }
  0x71   :  { %3562 = vmatpush3.bf16.msra.mxu0 %v3559_v21  ;;  %v3607_v21 = vpack.c.bf16 %v732_v20, %v731_v18  ;;  %v3611_v24 = vpack.c.bf16 %v734_v23, %v733_v22  ;;  %v736_v26 = vld [vmem:[#allocation9 + $0x38] sm:$0xff]  ;;  %v737_v28 = vld [vmem:[#allocation9 + $0x40] sm:$0xff]  ;;  %v739_v31 = vld [vmem:[#allocation9 + $0x50] sm:$0xff] }
  0x72   :  { %3564 = vmatprep.subr.bf16.mxu0 %v3563_v29  ;;  %3590 = vmatpush3.bf16.msra.mxu1 %v3587_v39  ;;  %v3615_v27 = vpack.c.bf16 %v736_v26, %v735_v25  ;;  %v740_v32 = vld [vmem:[#allocation9 + $0x58] sm:$0xff]  ;;  %v741_v34 = vld [vmem:[#allocation9 + $0x60] sm:$0xff]  ;;  %v743_v37 = vld [vmem:[#allocation9 + $0x70] sm:$0xff] }
  0x73   :  { %3592 = vmatprep.subr.bf16.mxu1 %v3591_v44  ;;  %v3623_v33 = vpack.c.bf16 %v740_v32, %v739_v31  ;;  %v744_v38 = vld [vmem:[#allocation9 + $0x78] sm:$0xff]  ;;  %v4093_v40 = vld [vmem:[%s4787_s2] ss:$0 sm:$0xff] }
  0x74   :  { %v3631_v39 = vpack.c.bf16 %v744_v38, %v743_v37 }
  0x75   :  { %3566 = vmatpush3.bf16.msra.mxu0 %v3563_v29  ;;  %v738_v29 = vld [vmem:[#allocation9 + $0x48] sm:$0xff] }
  0x76   :  { %3568 = vmatprep.subr.bf16.mxu0 %v3567_v35  ;;  %3594 = vmatpush3.bf16.msra.mxu1 %v3591_v44  ;;  %v3619_v30 = vpack.c.bf16 %v738_v29, %v737_v28 }
  0x77   :  { %3596 = vmatprep.subr.bf16.mxu1 %v3595_v49 }
  0x79   :  { %3570 = vmatpush3.bf16.msra.mxu0 %v3567_v35  ;;  %v742_v35 = vld [vmem:[#allocation9 + $0x68] sm:$0xff] }
  0x7a   :  { %3598 = vmatpush3.bf16.msra.mxu1 %v3595_v49  ;;  %3604 = vmatprep.subr.bf16.mxu0 %v3603_v19  ;;  %v3627_v36 = vpack.c.bf16 %v742_v35, %v741_v34 }
  0x7b   :  { %3600 = vmatprep.subr.bf16.mxu1 %v3599_v15 }
  0x7c   :  { %2932 = vmatmul.mubr.f32.vlgmr.msra.gmra.mrb[0].mxu0 %v106_v42 }
  0x7d   :  { %2934 = vmatprep.mubr.f32.mxu0 %v107_v43  ;;  %3606 = vmatpush3.bf16.msra.mxu0 %v3603_v19 }
  0x7e   :  { %3602 = vmatpush3.bf16.msra.mxu1 %v3599_v15  ;;  %3608 = vmatprep.subr.bf16.mxu0 %v3607_v21 }
  0x80   :  { %2935 = vmatmul.mubr.f32.gmra.mrb[2].mxu0 %v108_v47 }
  0x81   :  { %2937 = vmatprep.mubr.f32.mxu0 %v109_v48  ;;  %3610 = vmatpush3.bf16.msra.mxu0 %v3607_v21 }
  0x82   :  { %3612 = vmatprep.subr.bf16.mxu0 %v3611_v24 }
  0x84   :  { %2938 = vmatmul.mubr.f32.gmra.mrb[4].mxu0 %v110_v50 }
  0x85   :  { %2940 = vmatprep.mubr.f32.mxu0 %v111_v51  ;;  %3614 = vmatpush3.bf16.msra.mxu0 %v3611_v24 }
  0x86   :  { %3616 = vmatprep.subr.bf16.mxu0 %v3615_v27 }
  0x88   :  { %2941 = vmatmul.mubr.f32.gmra.mrb[6].mxu0 %v112_v52 }
  0x89   :  { %2943 = vmatprep.mubr.f32.mxu0 %v113_v53  ;;  %3618 = vmatpush3.bf16.msra.mxu0 %v3615_v27 }
  0x8a   :  { %3620 = vmatprep.subr.bf16.mxu0 %v3619_v30 }
  0x8c   :  { %2944 = vmatmul.mubr.f32.gmra.mrb[8].mxu0 %v114_v54 }
  0x8d   :  { %2946 = vmatprep.mubr.f32.mxu0 %v115_v55  ;;  %3622 = vmatpush3.bf16.msra.mxu0 %v3619_v30 }
  0x8e   :  { %3624 = vmatprep.subr.bf16.mxu0 %v3623_v33 }
  0x90   :  { %2947 = vmatmul.mubr.f32.gmra.mrb[10].mxu0 %v116_v56 }
  0x91   :  { %2949 = vmatprep.mubr.f32.mxu0 %v117_v57  ;;  %3626 = vmatpush3.bf16.msra.mxu0 %v3623_v33 }
  0x92   :  { %3628 = vmatprep.subr.bf16.mxu0 %v3627_v36 }
  0x94   :  { %2950 = vmatmul.mubr.f32.gmra.mrb[12].mxu0 %v118_v58 }
  0x95   :  { %2952 = vmatprep.mubr.f32.mxu0 %v119_v59  ;;  %3630 = vmatpush3.bf16.msra.mxu0 %v3627_v36 }
  0x96   :  { %3632 = vmatprep.subr.bf16.mxu0 %v3631_v39 }
  0x98   :  { %2953 = vmatmul.mubr.f32.gmra.mrb[14].mxu0 %v120_v60 }
  0x99   :  { %2955 = vmatprep.mubr.f32.mxu0 %v121_v61  ;;  %3634 = vmatpush3.bf16.msra.mxu0 %v3631_v39 }
  0x9c   :  { %2956 = vmatmul.mubr.f32.gmra.mrb[16].mxu0 %v122_v62 }
  0x9d   :  { %2958 = vmatprep.mubr.f32.mxu0 %v123_v63 }
  0xa0   :  { %2959 = vmatmul.mubr.f32.gmra.mrb[18].mxu0 %v124_v0 }
  0xa1   :  { %2961 = vmatprep.mubr.f32.mxu0 %v125_v1 }
  0xa4   :  { %2962 = vmatmul.mubr.f32.gmra.mrb[20].mxu0 %v126_v2 }
  0xa5   :  { %2964 = vmatprep.mubr.f32.mxu0 %v127_v3 }
  0xa8   :  { %2965 = vmatmul.mubr.f32.gmra.mrb[22].mxu0 %v128_v4 }
  0xa9   :  { %2967 = vmatprep.mubr.f32.mxu0 %v129_v5 }
  0xac   :  { %2968 = vmatmul.mubr.f32.gmra.mrb[24].mxu0 %v130_v6 }
  0xad   :  { %2970 = vmatprep.mubr.f32.mxu0 %v131_v7 }
  0xb0   :  { %2971 = vmatmul.mubr.f32.gmra.mrb[26].mxu0 %v132_v8 }
  0xb1   :  { %2973 = vmatprep.mubr.f32.mxu0 %v133_v9 }
  0xb4   :  { %2974 = vmatmul.mubr.f32.gmra.mrb[28].mxu0 %v134_v10 }
  0xb5   :  { %2976 = vmatprep.mubr.f32.mxu0 %v135_v11 }
  0xb8   :  { %2977 = vmatmul.mubr.f32.gmra.mrb[30].mxu0 %v136_v12 }
 0x14f   :  { %v2933_v41 = vpop.f32.mrb[0].mxu0 }
 0x150   :  { %v226_v42 = vpop.f32.mrb[1].mxu0  ;;  %v4099_v44 = vadd.f32 %v2933_v41, %v4093_v40 }
 0x151   :  { %v4096_v43 = vadd.f32 %v4093_v40, %v226_v42  ;;  %v1010_v42 = vld [vmem:[#allocation8 + $0x80] sm:$0xff] }
 0x153   :  { %v2936_v45 = vpop.f32.mrb[2].mxu0  ;;  %3011 = vmatprep.mubr.f32.mxu1 %v4096_v43 }
 0x154   :  { %v236_v46 = vpop.f32.mrb[3].mxu0  ;;  %3012 = vmatmul.mubr.f32.vlgmr.msra.gmra.mrb[0].mxu1 %v4099_v44  ;;  %v4107_v48 = vadd.f32 %v2936_v45, %v4093_v40  ;;  %v1011_v45 = vld [vmem:[#allocation8 + $0x88] sm:$0xff] }
 0x155   :  { %v4104_v47 = vadd.f32 %v4093_v40, %v236_v46  ;;  %v1012_v46 = vld [vmem:[#allocation8 + $0x90] sm:$0xff] }
 0x157   :  { %v2939_v49 = vpop.f32.mrb[4].mxu0  ;;  %3014 = vmatprep.mubr.f32.mxu1 %v4104_v47 }
 0x158   :  { %v246_v50 = vpop.f32.mrb[5].mxu0  ;;  %3015 = vmatmul.mubr.f32.gmra.mrb[2].mxu1 %v4107_v48  ;;  %v4115_v52 = vadd.f32 %v2939_v49, %v4093_v40  ;;  %v3635_v49 = vpack.c.bf16 %v1011_v45, %v1010_v42 }
 0x159   :  { %v4112_v51 = vadd.f32 %v4093_v40, %v246_v50  ;;  %v1013_v50 = vld [vmem:[#allocation8 + $0x98] sm:$0xff] }
 0x15a   :  { %3636 = vmatprep.subr.bf16.mxu1 %v3635_v49 }
 0x15b   :  { %v2942_v53 = vpop.f32.mrb[6].mxu0  ;;  %3017 = vmatprep.mubr.f32.mxu1 %v4112_v51  ;;  %3638 = vmatpush3.bf16.msra.mxu1 %v3635_v49 }
 0x15c   :  { %v256_v54 = vpop.f32.mrb[7].mxu0  ;;  %3018 = vmatmul.mubr.f32.gmra.mrb[4].mxu1 %v4115_v52  ;;  %v4123_v56 = vadd.f32 %v2942_v53, %v4093_v40  ;;  %v3639_v53 = vpack.c.bf16 %v1013_v50, %v1012_v46 }
 0x15d   :  { %v4120_v55 = vadd.f32 %v4093_v40, %v256_v54  ;;  %v1014_v54 = vld [vmem:[#allocation8 + $0xa0] sm:$0xff] }
 0x15e   :  { %3640 = vmatprep.subr.bf16.mxu1 %v3639_v53 }
 0x15f   :  { %v2945_v57 = vpop.f32.mrb[8].mxu0  ;;  %3020 = vmatprep.mubr.f32.mxu1 %v4120_v55  ;;  %3642 = vmatpush3.bf16.msra.mxu1 %v3639_v53 }
 0x160   :  { %v266_v58 = vpop.f32.mrb[9].mxu0  ;;  %3021 = vmatmul.mubr.f32.gmra.mrb[6].mxu1 %v4123_v56  ;;  %v4131_v60 = vadd.f32 %v2945_v57, %v4093_v40  ;;  %v1015_v57 = vld [vmem:[#allocation8 + $0xa8] sm:$0xff] }
 0x161   :  { %v4128_v59 = vadd.f32 %v4093_v40, %v266_v58  ;;  %v3643_v58 = vpack.c.bf16 %v1015_v57, %v1014_v54 }
 0x163   :  { %v2948_v61 = vpop.f32.mrb[10].mxu0  ;;  %3023 = vmatprep.mubr.f32.mxu1 %v4128_v59  ;;  %3644 = vmatprep.subr.bf16.mxu1 %v3643_v58 }
 0x164   :  { %v276_v62 = vpop.f32.mrb[11].mxu0  ;;  %3024 = vmatmul.mubr.f32.gmra.mrb[8].mxu1 %v4131_v60  ;;  %v4139_v0 = vadd.f32 %v2948_v61, %v4093_v40  ;;  %v1016_v61 = vld [vmem:[#allocation8 + $0xb0] sm:$0xff] }
 0x165   :  { %v4136_v63 = vadd.f32 %v4093_v40, %v276_v62  ;;  %v1017_v62 = vld [vmem:[#allocation8 + $0xb8] sm:$0xff]  ;;  %3646 = vmatpush3.bf16.msra.mxu1 %v3643_v58 }
 0x167   :  { %v2951_v1 = vpop.f32.mrb[12].mxu0  ;;  %3026 = vmatprep.mubr.f32.mxu1 %v4136_v63 }
 0x168   :  { %v286_v2 = vpop.f32.mrb[13].mxu0  ;;  %3027 = vmatmul.mubr.f32.gmra.mrb[10].mxu1 %v4139_v0  ;;  %v4147_v4 = vadd.f32 %v2951_v1, %v4093_v40  ;;  %v1018_v1 = vld [vmem:[#allocation8 + $0xc0] sm:$0xff] }
 0x169   :  { %v4144_v3 = vadd.f32 %v4093_v40, %v286_v2  ;;  %v1019_v2 = vld [vmem:[#allocation8 + $0xc8] sm:$0xff] }
 0x16b   :  { %v2954_v5 = vpop.f32.mrb[14].mxu0  ;;  %3029 = vmatprep.mubr.f32.mxu1 %v4144_v3 }
 0x16c   :  { %v296_v6 = vpop.f32.mrb[15].mxu0  ;;  %3030 = vmatmul.mubr.f32.gmra.mrb[12].mxu1 %v4147_v4  ;;  %v4155_v8 = vadd.f32 %v2954_v5, %v4093_v40  ;;  %v3651_v5 = vpack.c.bf16 %v1019_v2, %v1018_v1 }
 0x16d   :  { %v4152_v7 = vadd.f32 %v4093_v40, %v296_v6  ;;  %v1020_v6 = vld [vmem:[#allocation8 + $0xd0] sm:$0xff] }
 0x16f   :  { %v2957_v9 = vpop.f32.mrb[16].mxu0  ;;  %3032 = vmatprep.mubr.f32.mxu1 %v4152_v7 }
 0x170   :  { %v306_v10 = vpop.f32.mrb[17].mxu0  ;;  %3033 = vmatmul.mubr.f32.gmra.mrb[14].mxu1 %v4155_v8  ;;  %v4163_v12 = vadd.f32 %v2957_v9, %v4093_v40  ;;  %v1021_v9 = vld [vmem:[#allocation8 + $0xd8] sm:$0xff] }
 0x171   :  { %v4160_v11 = vadd.f32 %v4093_v40, %v306_v10  ;;  %v3655_v10 = vpack.c.bf16 %v1021_v9, %v1020_v6 }
 0x173   :  { %v2960_v13 = vpop.f32.mrb[18].mxu0  ;;  %3035 = vmatprep.mubr.f32.mxu1 %v4160_v11 }
 0x174   :  { %v316_v14 = vpop.f32.mrb[19].mxu0  ;;  %3036 = vmatmul.mubr.f32.gmra.mrb[16].mxu1 %v4163_v12  ;;  %v4171_v16 = vadd.f32 %v2960_v13, %v4093_v40  ;;  %v1022_v13 = vld [vmem:[#allocation8 + $0xe0] sm:$0xff] }
 0x175   :  { %v4168_v15 = vadd.f32 %v4093_v40, %v316_v14  ;;  %v1023_v14 = vld [vmem:[#allocation8 + $0xe8] sm:$0xff] }
 0x177   :  { %v2963_v17 = vpop.f32.mrb[20].mxu0  ;;  %3038 = vmatprep.mubr.f32.mxu1 %v4168_v15 }
 0x178   :  { %v326_v18 = vpop.f32.mrb[21].mxu0  ;;  %3039 = vmatmul.mubr.f32.gmra.mrb[18].mxu1 %v4171_v16  ;;  %v4179_v20 = vadd.f32 %v2963_v17, %v4093_v40  ;;  %v3659_v17 = vpack.c.bf16 %v1023_v14, %v1022_v13 }
 0x179   :  { %v4176_v19 = vadd.f32 %v4093_v40, %v326_v18  ;;  %v1024_v18 = vld [vmem:[#allocation8 + $0xf0] sm:$0xff] }
 0x17b   :  { %v2966_v21 = vpop.f32.mrb[22].mxu0  ;;  %3041 = vmatprep.mubr.f32.mxu1 %v4176_v19 }
 0x17c   :  { %v336_v22 = vpop.f32.mrb[23].mxu0  ;;  %3042 = vmatmul.mubr.f32.gmra.mrb[20].mxu1 %v4179_v20  ;;  %v4187_v24 = vadd.f32 %v2966_v21, %v4093_v40  ;;  %v1025_v21 = vld [vmem:[#allocation8 + $0xf8] sm:$0xff] }
 0x17d   :  { %v4184_v23 = vadd.f32 %v4093_v40, %v336_v22  ;;  %v3663_v22 = vpack.c.bf16 %v1025_v21, %v1024_v18 }
 0x17f   :  { %v2969_v25 = vpop.f32.mrb[24].mxu0  ;;  %3044 = vmatprep.mubr.f32.mxu1 %v4184_v23 }
 0x180   :  { %v346_v26 = vpop.f32.mrb[25].mxu0  ;;  %3045 = vmatmul.mubr.f32.gmra.mrb[22].mxu1 %v4187_v24  ;;  %v4195_v28 = vadd.f32 %v2969_v25, %v4093_v40  ;;  %v4226_v25 = vld [vmem:[%s4789_s4] ss:$0 sm:$0xff] }
 0x181   :  { %v4192_v27 = vadd.f32 %v4093_v40, %v346_v26 }
 0x183   :  { %v2972_v29 = vpop.f32.mrb[26].mxu0  ;;  %3047 = vmatprep.mubr.f32.mxu1 %v4192_v27 }
 0x184   :  { %v356_v30 = vpop.f32.mrb[27].mxu0  ;;  %3048 = vmatmul.mubr.f32.gmra.mrb[24].mxu1 %v4195_v28  ;;  %v4203_v32 = vadd.f32 %v2972_v29, %v4093_v40 }
 0x185   :  { %v4200_v31 = vadd.f32 %v4093_v40, %v356_v30 }
 0x187   :  { %v2975_v33 = vpop.f32.mrb[28].mxu0  ;;  %3050 = vmatprep.mubr.f32.mxu1 %v4200_v31 }
 0x188   :  { %v366_v34 = vpop.f32.mrb[29].mxu0  ;;  %3051 = vmatmul.mubr.f32.gmra.mrb[26].mxu1 %v4203_v32  ;;  %v4211_v36 = vadd.f32 %v2975_v33, %v4093_v40 }
 0x189   :  { %v4208_v35 = vadd.f32 %v4093_v40, %v366_v34 }
 0x18b   :  { %v2978_v37 = vpop.f32.mrb[30].mxu0  ;;  %3053 = vmatprep.mubr.f32.mxu1 %v4208_v35 }
 0x18c   :  { %v376_v38 = vpop.f32.mrb[31].mxu0  ;;  %3054 = vmatmul.mubr.f32.gmra.mrb[28].mxu1 %v4211_v36  ;;  %v4219_v41 = vadd.f32 %v2978_v37, %v4093_v40 }
 0x18d   :  { %v4216_v39 = vadd.f32 %v4093_v40, %v376_v38  ;;  %v3647_v40 = vpack.c.bf16 %v1017_v62, %v1016_v61 }
 0x18f   :  { %3056 = vmatprep.mubr.f32.mxu1 %v4216_v39  ;;  %3648 = vmatprep.subr.bf16.mxu1 %v3647_v40 }
 0x190   :  { %3057 = vmatmul.mubr.f32.gmra.mrb[30].mxu1 %v4219_v41 }
 0x191   :  { %3650 = vmatpush3.bf16.msra.mxu1 %v3647_v40 }
 0x192   :  { %3652 = vmatprep.subr.bf16.mxu1 %v3651_v5 }
 0x195   :  { %3654 = vmatpush3.bf16.msra.mxu1 %v3651_v5 }
 0x196   :  { %3656 = vmatprep.subr.bf16.mxu1 %v3655_v10 }
 0x199   :  { %3658 = vmatpush3.bf16.msra.mxu1 %v3655_v10 }
 0x19a   :  { %3660 = vmatprep.subr.bf16.mxu1 %v3659_v17 }
 0x19d   :  { %3662 = vmatpush3.bf16.msra.mxu1 %v3659_v17 }
 0x19e   :  { %3664 = vmatprep.subr.bf16.mxu1 %v3663_v22 }
 0x1a1   :  { %3666 = vmatpush3.bf16.msra.mxu1 %v3663_v22 }
 0x227   :  { %v3013_v26 = vpop.f32.mrb[0].mxu1 }
 0x228   :  { %v544_v29 = vadd.f32 %v3013_v26, %v4226_v25  ;;  %v538_v30 = vpop.f32.mrb[1].mxu1 }
 0x229   :  { %v539_v33 = vadd.f32 %v4226_v25, %v538_v30 }
 0x22a   :  { %v698_v38 = vmax.f32 %v544_v29, 0.0 }
 0x22b   :  { %v697_v34 = vmax.f32 %v539_v33, 0.0  ;;  %v3016_v37 = vpop.f32.mrb[2].mxu1 }
 0x22c   :  { %v554_v42 = vadd.f32 %v3016_v37, %v4226_v25  ;;  %v548_v45 = vpop.f32.mrb[3].mxu1 }
 0x22d   :  { %v549_v46 = vadd.f32 %v4226_v25, %v548_v45  ;;  %3091 = vmatprep.mubr.f32.mxu0 %v697_v34 }
 0x22e   :  { %3092 = vmatmul.mubr.f32.vlgmr.msra.gmra.mrb[32].mxu0 %v698_v38  ;;  %v700_v53 = vmax.f32 %v554_v42, 0.0 }
 0x22f   :  { %v699_v49 = vmax.f32 %v549_v46, 0.0  ;;  %v3019_v50 = vpop.f32.mrb[4].mxu1 }
 0x230   :  { %v564_v54 = vadd.f32 %v3019_v50, %v4226_v25  ;;  %v558_v57 = vpop.f32.mrb[5].mxu1 }
 0x231   :  { %v559_v58 = vadd.f32 %v4226_v25, %v558_v57  ;;  %3094 = vmatprep.mubr.f32.mxu0 %v699_v49 }
 0x232   :  { %3095 = vmatmul.mubr.f32.gmra.mrb[34].mxu0 %v700_v53  ;;  %v702_v40 = vmax.f32 %v564_v54, 0.0 }
 0x233   :  { %v701_v61 = vmax.f32 %v559_v58, 0.0  ;;  %v3022_v62 = vpop.f32.mrb[6].mxu1 }
 0x234   :  { %v574_v1 = vadd.f32 %v3022_v62, %v4226_v25  ;;  %v568_v2 = vpop.f32.mrb[7].mxu1 }
 0x235   :  { %v569_v5 = vadd.f32 %v4226_v25, %v568_v2  ;;  %3097 = vmatprep.mubr.f32.mxu0 %v701_v61 }
 0x236   :  { %3098 = vmatmul.mubr.f32.gmra.mrb[36].mxu0 %v702_v40  ;;  %v704_v10 = vmax.f32 %v574_v1, 0.0 }
 0x237   :  { %v703_v6 = vmax.f32 %v569_v5, 0.0  ;;  %v3025_v9 = vpop.f32.mrb[8].mxu1 }
 0x238   :  { %v584_v13 = vadd.f32 %v3025_v9, %v4226_v25  ;;  %v578_v14 = vpop.f32.mrb[9].mxu1 }
 0x239   :  { %v579_v17 = vadd.f32 %v4226_v25, %v578_v14  ;;  %3100 = vmatprep.mubr.f32.mxu0 %v703_v6 }
 0x23a   :  { %3101 = vmatmul.mubr.f32.gmra.mrb[38].mxu0 %v704_v10  ;;  %v706_v22 = vmax.f32 %v584_v13, 0.0 }
 0x23b   :  { %v705_v18 = vmax.f32 %v579_v17, 0.0  ;;  %v3028_v21 = vpop.f32.mrb[10].mxu1 }
 0x23c   :  { %v594_v26 = vadd.f32 %v3028_v21, %v4226_v25  ;;  %v588_v29 = vpop.f32.mrb[11].mxu1 }
 0x23d   :  { %v589_v30 = vadd.f32 %v4226_v25, %v588_v29  ;;  %3103 = vmatprep.mubr.f32.mxu0 %v705_v18 }
 0x23e   :  { %3104 = vmatmul.mubr.f32.gmra.mrb[40].mxu0 %v706_v22  ;;  %v708_v37 = vmax.f32 %v594_v26, 0.0 }
 0x23f   :  { %v707_v33 = vmax.f32 %v589_v30, 0.0  ;;  %v3031_v34 = vpop.f32.mrb[12].mxu1 }
 0x240   :  { %v604_v38 = vadd.f32 %v3031_v34, %v4226_v25  ;;  %v598_v42 = vpop.f32.mrb[13].mxu1 }
 0x241   :  { %v599_v45 = vadd.f32 %v4226_v25, %v598_v42  ;;  %3106 = vmatprep.mubr.f32.mxu0 %v707_v33 }
 0x242   :  { %3107 = vmatmul.mubr.f32.gmra.mrb[42].mxu0 %v708_v37  ;;  %v710_v50 = vmax.f32 %v604_v38, 0.0 }
 0x243   :  { %v709_v46 = vmax.f32 %v599_v45, 0.0  ;;  %v3034_v49 = vpop.f32.mrb[14].mxu1 }
 0x244   :  { %v614_v53 = vadd.f32 %v3034_v49, %v4226_v25  ;;  %v608_v54 = vpop.f32.mrb[15].mxu1 }
 0x245   :  { %v609_v57 = vadd.f32 %v4226_v25, %v608_v54  ;;  %3109 = vmatprep.mubr.f32.mxu0 %v709_v46 }
 0x246   :  { %3110 = vmatmul.mubr.f32.gmra.mrb[44].mxu0 %v710_v50  ;;  %v712_v62 = vmax.f32 %v614_v53, 0.0 }
 0x247   :  { %v711_v58 = vmax.f32 %v609_v57, 0.0  ;;  %v3037_v61 = vpop.f32.mrb[16].mxu1 }
 0x248   :  { %v624_v40 = vadd.f32 %v3037_v61, %v4226_v25  ;;  %v618_v1 = vpop.f32.mrb[17].mxu1 }
 0x249   :  { %v619_v2 = vadd.f32 %v4226_v25, %v618_v1  ;;  %3112 = vmatprep.mubr.f32.mxu0 %v711_v58 }
 0x24a   :  { %3113 = vmatmul.mubr.f32.gmra.mrb[46].mxu0 %v712_v62  ;;  %v714_v9 = vmax.f32 %v624_v40, 0.0 }
 0x24b   :  { %v713_v5 = vmax.f32 %v619_v2, 0.0  ;;  %v3040_v6 = vpop.f32.mrb[18].mxu1 }
 0x24c   :  { %v634_v10 = vadd.f32 %v3040_v6, %v4226_v25  ;;  %v628_v13 = vpop.f32.mrb[19].mxu1 }
 0x24d   :  { %v629_v14 = vadd.f32 %v4226_v25, %v628_v13  ;;  %3115 = vmatprep.mubr.f32.mxu0 %v713_v5 }
 0x24e   :  { %3116 = vmatmul.mubr.f32.gmra.mrb[48].mxu0 %v714_v9  ;;  %v716_v21 = vmax.f32 %v634_v10, 0.0 }
 0x24f   :  { %v715_v17 = vmax.f32 %v629_v14, 0.0  ;;  %v3043_v18 = vpop.f32.mrb[20].mxu1 }
 0x250   :  { %v644_v22 = vadd.f32 %v3043_v18, %v4226_v25  ;;  %v638_v26 = vpop.f32.mrb[21].mxu1 }
 0x251   :  { %v639_v29 = vadd.f32 %v4226_v25, %v638_v26  ;;  %3118 = vmatprep.mubr.f32.mxu0 %v715_v17 }
 0x252   :  { %3119 = vmatmul.mubr.f32.gmra.mrb[50].mxu0 %v716_v21  ;;  %v718_v34 = vmax.f32 %v644_v22, 0.0 }
 0x253   :  { %v717_v30 = vmax.f32 %v639_v29, 0.0  ;;  %v3046_v33 = vpop.f32.mrb[22].mxu1 }
 0x254   :  { %v654_v37 = vadd.f32 %v3046_v33, %v4226_v25  ;;  %v648_v38 = vpop.f32.mrb[23].mxu1  ;;  %v1292_v33 = vld [vmem:[#allocation9 + $0x80] sm:$0xff] }
 0x255   :  { %v649_v42 = vadd.f32 %v4226_v25, %v648_v38  ;;  %3121 = vmatprep.mubr.f32.mxu0 %v717_v30 }
 0x256   :  { %3122 = vmatmul.mubr.f32.gmra.mrb[52].mxu0 %v718_v34  ;;  %v720_v49 = vmax.f32 %v654_v37, 0.0  ;;  %v1293_v34 = vld [vmem:[#allocation9 + $0x88] sm:$0xff]  ;;  %v1294_v37 = vld [vmem:[#allocation9 + $0x90] sm:$0xff] }
 0x257   :  { %v719_v45 = vmax.f32 %v649_v42, 0.0  ;;  %v3049_v46 = vpop.f32.mrb[24].mxu1  ;;  %v3667_v38 = vpack.c.bf16 %v1293_v34, %v1292_v33  ;;  %v1295_v42 = vld [vmem:[#allocation9 + $0x98] sm:$0xff] }
 0x258   :  { %v664_v50 = vadd.f32 %v3049_v46, %v4226_v25  ;;  %v658_v53 = vpop.f32.mrb[25].mxu1  ;;  %v1296_v46 = vld [vmem:[#allocation9 + $0xa0] sm:$0xff] }
 0x259   :  { %v659_v54 = vadd.f32 %v4226_v25, %v658_v53  ;;  %3124 = vmatprep.mubr.f32.mxu0 %v719_v45  ;;  %v3671_v45 = vpack.c.bf16 %v1295_v42, %v1294_v37  ;;  %3668 = vmatprep.subr.bf16.mxu0 %v3667_v38  ;;  %v1298_v53 = vld [vmem:[#allocation9 + $0xb0] sm:$0xff] }
 0x25a   :  { %3125 = vmatmul.mubr.f32.gmra.mrb[54].mxu0 %v720_v49  ;;  %v722_v61 = vmax.f32 %v664_v50, 0.0  ;;  %v1297_v49 = vld [vmem:[#allocation9 + $0xa8] sm:$0xff] }
 0x25b   :  { %v721_v57 = vmax.f32 %v659_v54, 0.0  ;;  %v3052_v58 = vpop.f32.mrb[26].mxu1  ;;  %3670 = vmatpush3.bf16.msra.mxu0 %v3667_v38  ;;  %v3675_v50 = vpack.c.bf16 %v1297_v49, %v1296_v46 }
 0x25c   :  { %v674_v62 = vadd.f32 %v3052_v58, %v4226_v25  ;;  %v668_v40 = vpop.f32.mrb[27].mxu1  ;;  %3672 = vmatprep.subr.bf16.mxu0 %v3671_v45  ;;  %v1301_v58 = vld [vmem:[#allocation9 + $0xc8] sm:$0xff] }
 0x25d   :  { %v669_v1 = vadd.f32 %v4226_v25, %v668_v40  ;;  %3127 = vmatprep.mubr.f32.mxu0 %v721_v57  ;;  %v1300_v57 = vld [vmem:[#allocation9 + $0xc0] sm:$0xff]  ;;  %v1303_v40 = vld [vmem:[#allocation9 + $0xd8] sm:$0xff] }
 0x25e   :  { %3128 = vmatmul.mubr.f32.gmra.mrb[56].mxu0 %v722_v61  ;;  %v724_v6 = vmax.f32 %v674_v62, 0.0  ;;  %v3683_v61 = vpack.c.bf16 %v1301_v58, %v1300_v57  ;;  %v1302_v62 = vld [vmem:[#allocation9 + $0xd0] sm:$0xff] }
 0x25f   :  { %v723_v2 = vmax.f32 %v669_v1, 0.0  ;;  %v3055_v5 = vpop.f32.mrb[28].mxu1  ;;  %3674 = vmatpush3.bf16.msra.mxu0 %v3671_v45  ;;  %v3687_v1 = vpack.c.bf16 %v1303_v40, %v1302_v62 }
 0x260   :  { %v684_v9 = vadd.f32 %v3055_v5, %v4226_v25  ;;  %v678_v10 = vpop.f32.mrb[29].mxu1  ;;  %3676 = vmatprep.subr.bf16.mxu0 %v3675_v50  ;;  %v1305_v5 = vld [vmem:[#allocation9 + $0xe8] sm:$0xff] }
 0x261   :  { %v679_v13 = vadd.f32 %v4226_v25, %v678_v10  ;;  %3130 = vmatprep.mubr.f32.mxu0 %v723_v2  ;;  %v1304_v2 = vld [vmem:[#allocation9 + $0xe0] sm:$0xff]  ;;  %v1307_v10 = vld [vmem:[#allocation9 + $0xf8] sm:$0xff] }
 0x262   :  { %3131 = vmatmul.mubr.f32.gmra.mrb[58].mxu0 %v724_v6  ;;  %v726_v18 = vmax.f32 %v684_v9, 0.0  ;;  %v3691_v6 = vpack.c.bf16 %v1305_v5, %v1304_v2  ;;  %v1306_v9 = vld [vmem:[#allocation9 + $0xf0] sm:$0xff] }
 0x263   :  { %v725_v14 = vmax.f32 %v679_v13, 0.0  ;;  %v3058_v17 = vpop.f32.mrb[30].mxu1  ;;  %3678 = vmatpush3.bf16.msra.mxu0 %v3675_v50  ;;  %v3695_v13 = vpack.c.bf16 %v1307_v10, %v1306_v9 }
 0x264   :  { %v694_v21 = vadd.f32 %v3058_v17, %v4226_v25  ;;  %v688_v22 = vpop.f32.mrb[31].mxu1 }
 0x265   :  { %v689_v26 = vadd.f32 %v4226_v25, %v688_v22  ;;  %3133 = vmatprep.mubr.f32.mxu0 %v725_v14  ;;  %v1299_v25 = vld [vmem:[#allocation9 + $0xb8] sm:$0xff]  ;;  %v4263_v14 = vld [vmem:[%s4791_s6] ss:$0 sm:$0xff] }
 0x266   :  { %3134 = vmatmul.mubr.f32.gmra.mrb[60].mxu0 %v726_v18  ;;  %v728_v30 = vmax.f32 %v694_v21, 0.0  ;;  %v3679_v54 = vpack.c.bf16 %v1299_v25, %v1298_v53 }
 0x267   :  { %v727_v29 = vmax.f32 %v689_v26, 0.0 }
 0x268   :  { %3680 = vmatprep.subr.bf16.mxu0 %v3679_v54 }
 0x269   :  { %3136 = vmatprep.mubr.f32.mxu0 %v727_v29  ;;  %3682 = vmatpush3.bf16.msra.mxu0 %v3679_v54 }
 0x26a   :  { %3137 = vmatmul.mubr.f32.gmra.mrb[62].mxu0 %v728_v30  ;;  %3684 = vmatprep.subr.bf16.mxu0 %v3683_v61 }
 0x26d   :  { %3686 = vmatpush3.bf16.msra.mxu0 %v3683_v61 }
 0x26e   :  { %3688 = vmatprep.subr.bf16.mxu0 %v3687_v1 }
 0x271   :  { %3690 = vmatpush3.bf16.msra.mxu0 %v3687_v1 }
 0x272   :  { %3692 = vmatprep.subr.bf16.mxu0 %v3691_v6 }
 0x275   :  { %3694 = vmatpush3.bf16.msra.mxu0 %v3691_v6 }
 0x276   :  { %3696 = vmatprep.subr.bf16.mxu0 %v3695_v13 }
 0x279   :  { %3698 = vmatpush3.bf16.msra.mxu0 %v3695_v13 }
 0x301   :  { %v3093_v17 = vpop.f32.mrb[32].mxu0 }
 0x302   :  { %v824_v18 = vadd.f32 %v3093_v17, %v4263_v14  ;;  %v818_v21 = vpop.f32.mrb[33].mxu0 }
 0x303   :  { %v819_v22 = vadd.f32 %v4263_v14, %v818_v21 }
 0x304   :  { %v4271_v30 = vadd.f32 %v824_v18, %v4099_v44 }
 0x305   :  { %v4268_v26 = vadd.f32 %v819_v22, %v4096_v43  ;;  %v3096_v29 = vpop.f32.mrb[34].mxu0 }
 0x306   :  { %v834_v33 = vadd.f32 %v3096_v29, %v4263_v14  ;;  %v828_v34 = vpop.f32.mrb[35].mxu0 }
 0x307   :  { %v829_v37 = vadd.f32 %v4263_v14, %v828_v34  ;;  %3171 = vmatprep.mubr.f32.mxu1 %v4268_v26 }
 0x308   :  { %3172 = vmatmul.mubr.f32.vlgmr.msra.gmra.mrb[32].mxu1 %v4271_v30  ;;  %v4281_v43 = vadd.f32 %v834_v33, %v4107_v48 }
 0x309   :  { %v4278_v38 = vadd.f32 %v829_v37, %v4104_v47  ;;  %v3099_v42 = vpop.f32.mrb[36].mxu0 }
 0x30a   :  { %v844_v45 = vadd.f32 %v3099_v42, %v4263_v14  ;;  %v838_v44 = vpop.f32.mrb[37].mxu0 }
 0x30b   :  { %v839_v46 = vadd.f32 %v4263_v14, %v838_v44  ;;  %3174 = vmatprep.mubr.f32.mxu1 %v4278_v38 }
 0x30c   :  { %3175 = vmatmul.mubr.f32.gmra.mrb[34].mxu1 %v4281_v43  ;;  %v4291_v47 = vadd.f32 %v844_v45, %v4115_v52 }
 0x30d   :  { %v4288_v49 = vadd.f32 %v839_v46, %v4112_v51  ;;  %v3102_v50 = vpop.f32.mrb[38].mxu0 }
 0x30e   :  { %v854_v53 = vadd.f32 %v3102_v50, %v4263_v14  ;;  %v848_v48 = vpop.f32.mrb[39].mxu0 }
 0x30f   :  { %v849_v25 = vadd.f32 %v4263_v14, %v848_v48  ;;  %3177 = vmatprep.mubr.f32.mxu1 %v4288_v49 }
 0x310   :  { %3178 = vmatmul.mubr.f32.gmra.mrb[36].mxu1 %v4291_v47  ;;  %v4301_v51 = vadd.f32 %v854_v53, %v4123_v56 }
 0x311   :  { %v4298_v54 = vadd.f32 %v849_v25, %v4120_v55  ;;  %v3105_v57 = vpop.f32.mrb[40].mxu0 }
 0x312   :  { %v864_v58 = vadd.f32 %v3105_v57, %v4263_v14  ;;  %v858_v52 = vpop.f32.mrb[41].mxu0 }
 0x313   :  { %v859_v61 = vadd.f32 %v4263_v14, %v858_v52  ;;  %3180 = vmatprep.mubr.f32.mxu1 %v4298_v54 }
 0x314   :  { %3181 = vmatmul.mubr.f32.gmra.mrb[38].mxu1 %v4301_v51  ;;  %v4311_v55 = vadd.f32 %v864_v58, %v4131_v60 }
 0x315   :  { %v4308_v62 = vadd.f32 %v859_v61, %v4128_v59  ;;  %v3108_v40 = vpop.f32.mrb[42].mxu0 }
 0x316   :  { %v874_v1 = vadd.f32 %v3108_v40, %v4263_v14  ;;  %v868_v56 = vpop.f32.mrb[43].mxu0 }
 0x317   :  { %v869_v2 = vadd.f32 %v4263_v14, %v868_v56  ;;  %3183 = vmatprep.mubr.f32.mxu1 %v4308_v62 }
 0x318   :  { %3184 = vmatmul.mubr.f32.gmra.mrb[40].mxu1 %v4311_v55  ;;  %v4321_v59 = vadd.f32 %v874_v1, %v4139_v0 }
 0x319   :  { %v4318_v5 = vadd.f32 %v869_v2, %v4136_v63  ;;  %v3111_v6 = vpop.f32.mrb[44].mxu0 }
 0x31a   :  { %v884_v9 = vadd.f32 %v3111_v6, %v4263_v14  ;;  %v878_v60 = vpop.f32.mrb[45].mxu0 }
 0x31b   :  { %v879_v10 = vadd.f32 %v4263_v14, %v878_v60  ;;  %3186 = vmatprep.mubr.f32.mxu1 %v4318_v5 }
 0x31c   :  { %3187 = vmatmul.mubr.f32.gmra.mrb[42].mxu1 %v4321_v59  ;;  %v4331_v63 = vadd.f32 %v884_v9, %v4147_v4 }
 0x31d   :  { %v4328_v13 = vadd.f32 %v879_v10, %v4144_v3  ;;  %v3114_v17 = vpop.f32.mrb[46].mxu0 }
 0x31e   :  { %v894_v18 = vadd.f32 %v3114_v17, %v4263_v14  ;;  %v888_v0 = vpop.f32.mrb[47].mxu0 }
 0x31f   :  { %v889_v21 = vadd.f32 %v4263_v14, %v888_v0  ;;  %3189 = vmatprep.mubr.f32.mxu1 %v4328_v13 }
 0x320   :  { %3190 = vmatmul.mubr.f32.gmra.mrb[44].mxu1 %v4331_v63  ;;  %v4341_v3 = vadd.f32 %v894_v18, %v4155_v8 }
 0x321   :  { %v4338_v22 = vadd.f32 %v889_v21, %v4152_v7  ;;  %v3117_v29 = vpop.f32.mrb[48].mxu0 }
 0x322   :  { %v904_v33 = vadd.f32 %v3117_v29, %v4263_v14  ;;  %v898_v4 = vpop.f32.mrb[49].mxu0 }
 0x323   :  { %v899_v34 = vadd.f32 %v4263_v14, %v898_v4  ;;  %3192 = vmatprep.mubr.f32.mxu1 %v4338_v22 }
 0x324   :  { %3193 = vmatmul.mubr.f32.gmra.mrb[46].mxu1 %v4341_v3  ;;  %v4351_v7 = vadd.f32 %v904_v33, %v4163_v12 }
 0x325   :  { %v4348_v37 = vadd.f32 %v899_v34, %v4160_v11  ;;  %v3120_v42 = vpop.f32.mrb[50].mxu0 }
 0x326   :  { %v914_v45 = vadd.f32 %v3120_v42, %v4263_v14  ;;  %v908_v8 = vpop.f32.mrb[51].mxu0 }
 0x327   :  { %v909_v44 = vadd.f32 %v4263_v14, %v908_v8  ;;  %3195 = vmatprep.mubr.f32.mxu1 %v4348_v37 }
 0x328   :  { %3196 = vmatmul.mubr.f32.gmra.mrb[48].mxu1 %v4351_v7  ;;  %v4361_v11 = vadd.f32 %v914_v45, %v4171_v16  ;;  %v1576_v45 = vld [vmem:[#allocation8 + $0x110] sm:$0xff] }
 0x329   :  { %v4358_v46 = vadd.f32 %v909_v44, %v4168_v15  ;;  %v3123_v50 = vpop.f32.mrb[52].mxu0  ;;  %v1577_v44 = vld [vmem:[#allocation8 + $0x118] sm:$0xff] }
 0x32a   :  { %v924_v53 = vadd.f32 %v3123_v50, %v4263_v14  ;;  %v918_v12 = vpop.f32.mrb[53].mxu0  ;;  %v1578_v50 = vld [vmem:[#allocation8 + $0x120] sm:$0xff] }
 0x32b   :  { %v919_v48 = vadd.f32 %v4263_v14, %v918_v12  ;;  %3198 = vmatprep.mubr.f32.mxu1 %v4358_v46  ;;  %v1580_v12 = vld [vmem:[#allocation8 + $0x130] sm:$0xff] }
 0x32c   :  { %3199 = vmatmul.mubr.f32.gmra.mrb[50].mxu1 %v4361_v11  ;;  %v4371_v15 = vadd.f32 %v924_v53, %v4179_v20  ;;  %v1579_v53 = vld [vmem:[#allocation8 + $0x128] sm:$0xff] }
 0x32d   :  { %v4368_v25 = vadd.f32 %v919_v48, %v4176_v19  ;;  %v3126_v57 = vpop.f32.mrb[54].mxu0  ;;  %v1581_v48 = vld [vmem:[#allocation8 + $0x138] sm:$0xff] }
 0x32e   :  { %v934_v58 = vadd.f32 %v3126_v57, %v4263_v14  ;;  %v928_v16 = vpop.f32.mrb[55].mxu0  ;;  %v1582_v57 = vld [vmem:[#allocation8 + $0x140] sm:$0xff] }
 0x32f   :  { %v929_v52 = vadd.f32 %v4263_v14, %v928_v16  ;;  %3201 = vmatprep.mubr.f32.mxu1 %v4368_v25 }
 0x330   :  { %3202 = vmatmul.mubr.f32.gmra.mrb[52].mxu1 %v4371_v15  ;;  %v4381_v19 = vadd.f32 %v934_v58, %v4187_v24  ;;  %v1583_v58 = vld [vmem:[#allocation8 + $0x148] sm:$0xff] }
 0x331   :  { %v4378_v61 = vadd.f32 %v929_v52, %v4184_v23  ;;  %v3129_v40 = vpop.f32.mrb[56].mxu0  ;;  %v3715_v16 = vpack.c.bf16 %v1583_v58, %v1582_v57  ;;  %v1584_v52 = vld [vmem:[#allocation8 + $0x150] sm:$0xff] }
 0x332   :  { %v944_v1 = vadd.f32 %v3129_v40, %v4263_v14  ;;  %v938_v20 = vpop.f32.mrb[57].mxu0  ;;  %v1585_v40 = vld [vmem:[#allocation8 + $0x158] sm:$0xff] }
 0x333   :  { %v939_v56 = vadd.f32 %v4263_v14, %v938_v20  ;;  %3204 = vmatprep.mubr.f32.mxu1 %v4378_v61  ;;  %v1586_v20 = vld [vmem:[#allocation8 + $0x160] sm:$0xff] }
 0x334   :  { %3205 = vmatmul.mubr.f32.gmra.mrb[54].mxu1 %v4381_v19  ;;  %v4391_v23 = vadd.f32 %v944_v1, %v4195_v28  ;;  %v3719_v1 = vpack.c.bf16 %v1585_v40, %v1584_v52 }
 0x335   :  { %v4388_v2 = vadd.f32 %v939_v56, %v4192_v27  ;;  %v3132_v6 = vpop.f32.mrb[58].mxu0  ;;  %v1587_v56 = vld [vmem:[#allocation8 + $0x168] sm:$0xff] }
 0x336   :  { %v954_v9 = vadd.f32 %v3132_v6, %v4263_v14  ;;  %v948_v24 = vpop.f32.mrb[59].mxu0  ;;  %v3723_v6 = vpack.c.bf16 %v1587_v56, %v1586_v20 }
 0x337   :  { %v949_v60 = vadd.f32 %v4263_v14, %v948_v24  ;;  %3207 = vmatprep.mubr.f32.mxu1 %v4388_v2  ;;  %v1589_v24 = vld [vmem:[#allocation8 + $0x178] sm:$0xff] }
 0x338   :  { %3208 = vmatmul.mubr.f32.gmra.mrb[56].mxu1 %v4391_v23  ;;  %v4401_v27 = vadd.f32 %v954_v9, %v4203_v32  ;;  %v1588_v9 = vld [vmem:[#allocation8 + $0x170] sm:$0xff] }
 0x339   :  { %v4398_v10 = vadd.f32 %v949_v60, %v4200_v31  ;;  %v3135_v17 = vpop.f32.mrb[60].mxu0  ;;  %v3727_v60 = vpack.c.bf16 %v1589_v24, %v1588_v9 }
 0x33a   :  { %v964_v18 = vadd.f32 %v3135_v17, %v4263_v14  ;;  %v958_v28 = vpop.f32.mrb[61].mxu0  ;;  %v4428_v17 = vld [vmem:[%s4789_s4 + $0x1] ss:$0 sm:$0xff] }
 0x33b   :  { %v959_v0 = vadd.f32 %v4263_v14, %v958_v28  ;;  %3210 = vmatprep.mubr.f32.mxu1 %v4398_v10 }
 0x33c   :  { %3211 = vmatmul.mubr.f32.gmra.mrb[58].mxu1 %v4401_v27  ;;  %v4411_v31 = vadd.f32 %v964_v18, %v4211_v36  ;;  %v1575_v36 = vld [vmem:[#allocation8 + $0x108] sm:$0xff] }
 0x33d   :  { %v4408_v21 = vadd.f32 %v959_v0, %v4208_v35  ;;  %v3138_v29 = vpop.f32.mrb[62].mxu0  ;;  %v1574_v35 = vld [vmem:[#allocation8 + $0x100] sm:$0xff] }
 0x33e   :  { %v974_v33 = vadd.f32 %v3138_v29, %v4263_v14  ;;  %v968_v32 = vpop.f32.mrb[63].mxu0  ;;  %v3699_v8 = vpack.c.bf16 %v1575_v36, %v1574_v35 }
 0x33f   :  { %v969_v4 = vadd.f32 %v4263_v14, %v968_v32  ;;  %3213 = vmatprep.mubr.f32.mxu1 %v4408_v21  ;;  %v3703_v14 = vpack.c.bf16 %v1577_v44, %v1576_v45 }
 0x340   :  { %3214 = vmatmul.mubr.f32.gmra.mrb[60].mxu1 %v4411_v31  ;;  %v4421_v42 = vadd.f32 %v974_v33, %v4219_v41  ;;  %3700 = vmatprep.subr.bf16.mxu1 %v3699_v8  ;;  %v3711_v41 = vpack.c.bf16 %v1581_v48, %v1580_v12 }
 0x341   :  { %v4418_v34 = vadd.f32 %v969_v4, %v4216_v39  ;;  %3702 = vmatpush3.bf16.msra.mxu1 %v3699_v8  ;;  %v3707_v39 = vpack.c.bf16 %v1579_v53, %v1578_v50 }
 0x342   :  { %3704 = vmatprep.subr.bf16.mxu1 %v3703_v14 }
 0x343   :  { %3216 = vmatprep.mubr.f32.mxu1 %v4418_v34 }
 0x344   :  { %3217 = vmatmul.mubr.f32.gmra.mrb[62].mxu1 %v4421_v42 }
 0x345   :  { %3706 = vmatpush3.bf16.msra.mxu1 %v3703_v14 }
 0x346   :  { %3708 = vmatprep.subr.bf16.mxu1 %v3707_v39 }
 0x349   :  { %3710 = vmatpush3.bf16.msra.mxu1 %v3707_v39 }
 0x34a   :  { %3712 = vmatprep.subr.bf16.mxu1 %v3711_v41 }
 0x34d   :  { %3714 = vmatpush3.bf16.msra.mxu1 %v3711_v41 }
 0x34e   :  { %3716 = vmatprep.subr.bf16.mxu1 %v3715_v16 }
 0x351   :  { %3718 = vmatpush3.bf16.msra.mxu1 %v3715_v16 }
 0x352   :  { %3720 = vmatprep.subr.bf16.mxu1 %v3719_v1 }
 0x355   :  { %3722 = vmatpush3.bf16.msra.mxu1 %v3719_v1 }
 0x356   :  { %3724 = vmatprep.subr.bf16.mxu1 %v3723_v6 }
 0x359   :  { %3726 = vmatpush3.bf16.msra.mxu1 %v3723_v6 }
 0x35a   :  { %3728 = vmatprep.subr.bf16.mxu1 %v3727_v60 }
 0x35d   :  { %3730 = vmatpush3.bf16.msra.mxu1 %v3727_v60 }
 0x3db   :  { %v3173_v18 = vpop.f32.mrb[32].mxu1 }
 0x3dc   :  { %v1106_v28 = vadd.f32 %v3173_v18, %v4428_v17  ;;  %v1100_v0 = vpop.f32.mrb[33].mxu1 }
 0x3dd   :  { %v1101_v29 = vadd.f32 %v4428_v17, %v1100_v0 }
 0x3de   :  { %v1260_v4 = vmax.f32 %v1106_v28, 0.0 }
 0x3df   :  { %v1259_v33 = vmax.f32 %v1101_v29, 0.0  ;;  %v3176_v32 = vpop.f32.mrb[34].mxu1 }
 0x3e0   :  { %v1116_v35 = vadd.f32 %v3176_v32, %v4428_v17  ;;  %v1110_v36 = vpop.f32.mrb[35].mxu1 }
 0x3e1   :  { %v1111_v45 = vadd.f32 %v4428_v17, %v1110_v36  ;;  %3251 = vmatprep.mubr.f32.mxu0 %v1259_v33 }
 0x3e2   :  { %3252 = vmatmul.mubr.f32.vlgmr.msra.gmra.mrb[64].mxu0 %v1260_v4  ;;  %v1262_v14 = vmax.f32 %v1116_v35, 0.0 }
 0x3e3   :  { %v1261_v8 = vmax.f32 %v1111_v45, 0.0  ;;  %v3179_v44 = vpop.f32.mrb[36].mxu1 }
 0x3e4   :  { %v1126_v50 = vadd.f32 %v3179_v44, %v4428_v17  ;;  %v1120_v53 = vpop.f32.mrb[37].mxu1 }
 0x3e5   :  { %v1121_v39 = vadd.f32 %v4428_v17, %v1120_v53  ;;  %3254 = vmatprep.mubr.f32.mxu0 %v1261_v8 }
 0x3e6   :  { %3255 = vmatmul.mubr.f32.gmra.mrb[66].mxu0 %v1262_v14  ;;  %v1264_v41 = vmax.f32 %v1126_v50, 0.0 }
 0x3e7   :  { %v1263_v12 = vmax.f32 %v1121_v39, 0.0  ;;  %v3182_v48 = vpop.f32.mrb[38].mxu1 }
 0x3e8   :  { %v1136_v57 = vadd.f32 %v3182_v48, %v4428_v17  ;;  %v1130_v58 = vpop.f32.mrb[39].mxu1 }
 0x3e9   :  { %v1131_v16 = vadd.f32 %v4428_v17, %v1130_v58  ;;  %3257 = vmatprep.mubr.f32.mxu0 %v1263_v12 }
 0x3ea   :  { %3258 = vmatmul.mubr.f32.gmra.mrb[68].mxu0 %v1264_v41  ;;  %v1266_v1 = vmax.f32 %v1136_v57, 0.0 }
 0x3eb   :  { %v1265_v52 = vmax.f32 %v1131_v16, 0.0  ;;  %v3185_v40 = vpop.f32.mrb[40].mxu1 }
 0x3ec   :  { %v1146_v20 = vadd.f32 %v3185_v40, %v4428_v17  ;;  %v1140_v56 = vpop.f32.mrb[41].mxu1 }
 0x3ed   :  { %v1141_v6 = vadd.f32 %v4428_v17, %v1140_v56  ;;  %3260 = vmatprep.mubr.f32.mxu0 %v1265_v52 }
 0x3ee   :  { %3261 = vmatmul.mubr.f32.gmra.mrb[70].mxu0 %v1266_v1  ;;  %v1268_v60 = vmax.f32 %v1146_v20, 0.0 }
 0x3ef   :  { %v1267_v9 = vmax.f32 %v1141_v6, 0.0  ;;  %v3188_v24 = vpop.f32.mrb[42].mxu1 }
 0x3f0   :  { %v1156_v18 = vadd.f32 %v3188_v24, %v4428_v17  ;;  %v1150_v28 = vpop.f32.mrb[43].mxu1 }
 0x3f1   :  { %v1151_v0 = vadd.f32 %v4428_v17, %v1150_v28  ;;  %3263 = vmatprep.mubr.f32.mxu0 %v1267_v9 }
 0x3f2   :  { %3264 = vmatmul.mubr.f32.gmra.mrb[72].mxu0 %v1268_v60  ;;  %v1270_v32 = vmax.f32 %v1156_v18, 0.0 }
 0x3f3   :  { %v1269_v29 = vmax.f32 %v1151_v0, 0.0  ;;  %v3191_v33 = vpop.f32.mrb[44].mxu1 }
 0x3f4   :  { %v1166_v4 = vadd.f32 %v3191_v33, %v4428_v17  ;;  %v1160_v35 = vpop.f32.mrb[45].mxu1 }
 0x3f5   :  { %v1161_v36 = vadd.f32 %v4428_v17, %v1160_v35  ;;  %3266 = vmatprep.mubr.f32.mxu0 %v1269_v29 }
 0x3f6   :  { %3267 = vmatmul.mubr.f32.gmra.mrb[74].mxu0 %v1270_v32  ;;  %v1272_v44 = vmax.f32 %v1166_v4, 0.0 }
 0x3f7   :  { %v1271_v45 = vmax.f32 %v1161_v36, 0.0  ;;  %v3194_v8 = vpop.f32.mrb[46].mxu1 }
 0x3f8   :  { %v1176_v14 = vadd.f32 %v3194_v8, %v4428_v17  ;;  %v1170_v50 = vpop.f32.mrb[47].mxu1 }
 0x3f9   :  { %v1171_v53 = vadd.f32 %v4428_v17, %v1170_v50  ;;  %3269 = vmatprep.mubr.f32.mxu0 %v1271_v45 }
 0x3fa   :  { %3270 = vmatmul.mubr.f32.gmra.mrb[76].mxu0 %v1272_v44  ;;  %v1274_v48 = vmax.f32 %v1176_v14, 0.0 }
 0x3fb   :  { %v1273_v39 = vmax.f32 %v1171_v53, 0.0  ;;  %v3197_v12 = vpop.f32.mrb[48].mxu1 }
 0x3fc   :  { %v1186_v41 = vadd.f32 %v3197_v12, %v4428_v17  ;;  %v1180_v57 = vpop.f32.mrb[49].mxu1 }
 0x3fd   :  { %v1181_v58 = vadd.f32 %v4428_v17, %v1180_v57  ;;  %3272 = vmatprep.mubr.f32.mxu0 %v1273_v39 }
 0x3fe   :  { %3273 = vmatmul.mubr.f32.gmra.mrb[78].mxu0 %v1274_v48  ;;  %v1276_v40 = vmax.f32 %v1186_v41, 0.0 }
 0x3ff   :  { %v1275_v16 = vmax.f32 %v1181_v58, 0.0  ;;  %v3200_v52 = vpop.f32.mrb[50].mxu1 }
 0x400   :  { %v1196_v1 = vadd.f32 %v3200_v52, %v4428_v17  ;;  %v1190_v20 = vpop.f32.mrb[51].mxu1 }
 0x401   :  { %v1191_v56 = vadd.f32 %v4428_v17, %v1190_v20  ;;  %3275 = vmatprep.mubr.f32.mxu0 %v1275_v16 }
 0x402   :  { %3276 = vmatmul.mubr.f32.gmra.mrb[80].mxu0 %v1276_v40  ;;  %v1278_v24 = vmax.f32 %v1196_v1, 0.0 }
 0x403   :  { %v1277_v6 = vmax.f32 %v1191_v56, 0.0  ;;  %v3203_v9 = vpop.f32.mrb[52].mxu1 }
 0x404   :  { %v1206_v60 = vadd.f32 %v3203_v9, %v4428_v17  ;;  %v1200_v18 = vpop.f32.mrb[53].mxu1 }
 0x405   :  { %v1201_v28 = vadd.f32 %v4428_v17, %v1200_v18  ;;  %3278 = vmatprep.mubr.f32.mxu0 %v1277_v6 }
 0x406   :  { %3279 = vmatmul.mubr.f32.gmra.mrb[82].mxu0 %v1278_v24  ;;  %v1280_v33 = vmax.f32 %v1206_v60, 0.0 }
 0x407   :  { %v1279_v0 = vmax.f32 %v1201_v28, 0.0  ;;  %v3206_v29 = vpop.f32.mrb[54].mxu1 }
 0x408   :  { %v1216_v32 = vadd.f32 %v3206_v29, %v4428_v17  ;;  %v1210_v4 = vpop.f32.mrb[55].mxu1  ;;  %v1856_v29 = vld [vmem:[#allocation9 + $0x100] sm:$0xff] }
 0x409   :  { %v1211_v35 = vadd.f32 %v4428_v17, %v1210_v4  ;;  %3281 = vmatprep.mubr.f32.mxu0 %v1279_v0 }
 0x40a   :  { %3282 = vmatmul.mubr.f32.gmra.mrb[84].mxu0 %v1280_v33  ;;  %v1282_v8 = vmax.f32 %v1216_v32, 0.0  ;;  %v1857_v33 = vld [vmem:[#allocation9 + $0x108] sm:$0xff]  ;;  %v1858_v32 = vld [vmem:[#allocation9 + $0x110] sm:$0xff] }
 0x40b   :  { %v1281_v36 = vmax.f32 %v1211_v35, 0.0  ;;  %v3209_v45 = vpop.f32.mrb[56].mxu1  ;;  %v3731_v4 = vpack.c.bf16 %v1857_v33, %v1856_v29  ;;  %v1859_v35 = vld [vmem:[#allocation9 + $0x118] sm:$0xff] }
 0x40c   :  { %v1226_v44 = vadd.f32 %v3209_v45, %v4428_v17  ;;  %v1220_v14 = vpop.f32.mrb[57].mxu1  ;;  %v1860_v45 = vld [vmem:[#allocation9 + $0x120] sm:$0xff] }
 0x40d   :  { %v1221_v50 = vadd.f32 %v4428_v17, %v1220_v14  ;;  %3284 = vmatprep.mubr.f32.mxu0 %v1281_v36  ;;  %v3735_v36 = vpack.c.bf16 %v1859_v35, %v1858_v32  ;;  %3732 = vmatprep.subr.bf16.mxu0 %v3731_v4  ;;  %v1862_v14 = vld [vmem:[#allocation9 + $0x130] sm:$0xff] }
 0x40e   :  { %3285 = vmatmul.mubr.f32.gmra.mrb[86].mxu0 %v1282_v8  ;;  %v1284_v12 = vmax.f32 %v1226_v44, 0.0  ;;  %v1861_v8 = vld [vmem:[#allocation9 + $0x128] sm:$0xff] }
 0x40f   :  { %v1283_v53 = vmax.f32 %v1221_v50, 0.0  ;;  %v3212_v39 = vpop.f32.mrb[58].mxu1  ;;  %3734 = vmatpush3.bf16.msra.mxu0 %v3731_v4  ;;  %v3739_v44 = vpack.c.bf16 %v1861_v8, %v1860_v45 }
 0x410   :  { %v1236_v48 = vadd.f32 %v3212_v39, %v4428_v17  ;;  %v1230_v41 = vpop.f32.mrb[59].mxu1  ;;  %3736 = vmatprep.subr.bf16.mxu0 %v3735_v36  ;;  %v1865_v39 = vld [vmem:[#allocation9 + $0x148] sm:$0xff] }
 0x411   :  { %v1231_v57 = vadd.f32 %v4428_v17, %v1230_v41  ;;  %3287 = vmatprep.mubr.f32.mxu0 %v1283_v53  ;;  %v1864_v53 = vld [vmem:[#allocation9 + $0x140] sm:$0xff]  ;;  %v1867_v41 = vld [vmem:[#allocation9 + $0x158] sm:$0xff] }
 0x412   :  { %3288 = vmatmul.mubr.f32.gmra.mrb[88].mxu0 %v1284_v12  ;;  %v1286_v52 = vmax.f32 %v1236_v48, 0.0  ;;  %v3747_v12 = vpack.c.bf16 %v1865_v39, %v1864_v53  ;;  %v1866_v48 = vld [vmem:[#allocation9 + $0x150] sm:$0xff] }
 0x413   :  { %v1285_v58 = vmax.f32 %v1231_v57, 0.0  ;;  %v3215_v16 = vpop.f32.mrb[60].mxu1  ;;  %3738 = vmatpush3.bf16.msra.mxu0 %v3735_v36  ;;  %v3751_v57 = vpack.c.bf16 %v1867_v41, %v1866_v48 }
 0x414   :  { %v1246_v40 = vadd.f32 %v3215_v16, %v4428_v17  ;;  %v1240_v1 = vpop.f32.mrb[61].mxu1  ;;  %3740 = vmatprep.subr.bf16.mxu0 %v3739_v44  ;;  %v1869_v16 = vld [vmem:[#allocation9 + $0x168] sm:$0xff] }
 0x415   :  { %v1241_v20 = vadd.f32 %v4428_v17, %v1240_v1  ;;  %3290 = vmatprep.mubr.f32.mxu0 %v1285_v58  ;;  %v1868_v58 = vld [vmem:[#allocation9 + $0x160] sm:$0xff]  ;;  %v1871_v1 = vld [vmem:[#allocation9 + $0x178] sm:$0xff] }
 0x416   :  { %3291 = vmatmul.mubr.f32.gmra.mrb[90].mxu0 %v1286_v52  ;;  %v1288_v9 = vmax.f32 %v1246_v40, 0.0  ;;  %v3755_v52 = vpack.c.bf16 %v1869_v16, %v1868_v58  ;;  %v1870_v40 = vld [vmem:[#allocation9 + $0x170] sm:$0xff] }
 0x417   :  { %v1287_v56 = vmax.f32 %v1241_v20, 0.0  ;;  %v3218_v6 = vpop.f32.mrb[62].mxu1  ;;  %3742 = vmatpush3.bf16.msra.mxu0 %v3739_v44  ;;  %v3759_v20 = vpack.c.bf16 %v1871_v1, %v1870_v40 }
 0x418   :  { %v1256_v24 = vadd.f32 %v3218_v6, %v4428_v17  ;;  %v1250_v60 = vpop.f32.mrb[63].mxu1 }
 0x419   :  { %v1251_v18 = vadd.f32 %v4428_v17, %v1250_v60  ;;  %3293 = vmatprep.mubr.f32.mxu0 %v1287_v56  ;;  %v1863_v17 = vld [vmem:[#allocation9 + $0x138] sm:$0xff]  ;;  %v4465_v56 = vld [vmem:[%s4791_s6 + $0x1] ss:$0 sm:$0xff] }
 0x41a   :  { %3294 = vmatmul.mubr.f32.gmra.mrb[92].mxu0 %v1288_v9  ;;  %v1290_v0 = vmax.f32 %v1256_v24, 0.0  ;;  %v3743_v50 = vpack.c.bf16 %v1863_v17, %v1862_v14 }
 0x41b   :  { %v1289_v28 = vmax.f32 %v1251_v18, 0.0 }
 0x41c   :  { %3744 = vmatprep.subr.bf16.mxu0 %v3743_v50 }
 0x41d   :  { %3296 = vmatprep.mubr.f32.mxu0 %v1289_v28  ;;  %3746 = vmatpush3.bf16.msra.mxu0 %v3743_v50 }
 0x41e   :  { %3297 = vmatmul.mubr.f32.gmra.mrb[94].mxu0 %v1290_v0  ;;  %3748 = vmatprep.subr.bf16.mxu0 %v3747_v12 }
 0x421   :  { %3750 = vmatpush3.bf16.msra.mxu0 %v3747_v12 }
 0x422   :  { %3752 = vmatprep.subr.bf16.mxu0 %v3751_v57 }
 0x425   :  { %3754 = vmatpush3.bf16.msra.mxu0 %v3751_v57 }
 0x426   :  { %3756 = vmatprep.subr.bf16.mxu0 %v3755_v52 }
 0x429   :  { %3758 = vmatpush3.bf16.msra.mxu0 %v3755_v52 }
 0x42a   :  { %3760 = vmatprep.subr.bf16.mxu0 %v3759_v20 }
 0x42d   :  { %3762 = vmatpush3.bf16.msra.mxu0 %v3759_v20 }
 0x4b5   :  { %v3253_v6 = vpop.f32.mrb[64].mxu0 }
 0x4b6   :  { %v1388_v9 = vadd.f32 %v3253_v6, %v4465_v56  ;;  %v1382_v24 = vpop.f32.mrb[65].mxu0 }
 0x4b7   :  { %v1383_v60 = vadd.f32 %v4465_v56, %v1382_v24 }
 0x4b8   :  { %v4473_v0 = vadd.f32 %v1388_v9, %v4271_v30 }
 0x4b9   :  { %v4470_v18 = vadd.f32 %v1383_v60, %v4268_v26  ;;  %v3256_v28 = vpop.f32.mrb[66].mxu0 }
 0x4ba   :  { %v1398_v29 = vadd.f32 %v3256_v28, %v4465_v56  ;;  %v1392_v33 = vpop.f32.mrb[67].mxu0 }
 0x4bb   :  { %v1393_v32 = vadd.f32 %v4465_v56, %v1392_v33  ;;  %3331 = vmatprep.mubr.f32.mxu1 %v4470_v18 }
 0x4bc   :  { %3332 = vmatmul.mubr.f32.vlgmr.msra.gmra.mrb[64].mxu1 %v4473_v0  ;;  %v4483_v26 = vadd.f32 %v1398_v29, %v4281_v43 }
 0x4bd   :  { %v4480_v4 = vadd.f32 %v1393_v32, %v4278_v38  ;;  %v3259_v35 = vpop.f32.mrb[68].mxu0 }
 0x4be   :  { %v1408_v36 = vadd.f32 %v3259_v35, %v4465_v56  ;;  %v1402_v30 = vpop.f32.mrb[69].mxu0 }
 0x4bf   :  { %v1403_v45 = vadd.f32 %v4465_v56, %v1402_v30  ;;  %3334 = vmatprep.mubr.f32.mxu1 %v4480_v4 }
 0x4c0   :  { %3335 = vmatmul.mubr.f32.gmra.mrb[66].mxu1 %v4483_v26  ;;  %v4493_v38 = vadd.f32 %v1408_v36, %v4291_v47 }
 0x4c1   :  { %v4490_v8 = vadd.f32 %v1403_v45, %v4288_v49  ;;  %v3262_v44 = vpop.f32.mrb[70].mxu0 }
 0x4c2   :  { %v1418_v14 = vadd.f32 %v3262_v44, %v4465_v56  ;;  %v1412_v43 = vpop.f32.mrb[71].mxu0 }
 0x4c3   :  { %v1413_v17 = vadd.f32 %v4465_v56, %v1412_v43  ;;  %3337 = vmatprep.mubr.f32.mxu1 %v4490_v8 }
 0x4c4   :  { %3338 = vmatmul.mubr.f32.gmra.mrb[68].mxu1 %v4493_v38  ;;  %v4503_v49 = vadd.f32 %v1418_v14, %v4301_v51 }
 0x4c5   :  { %v4500_v50 = vadd.f32 %v1413_v17, %v4298_v54  ;;  %v3265_v53 = vpop.f32.mrb[72].mxu0 }
 0x4c6   :  { %v1428_v39 = vadd.f32 %v3265_v53, %v4465_v56  ;;  %v1422_v47 = vpop.f32.mrb[73].mxu0 }
 0x4c7   :  { %v1423_v12 = vadd.f32 %v4465_v56, %v1422_v47  ;;  %3340 = vmatprep.mubr.f32.mxu1 %v4500_v50 }
 0x4c8   :  { %3341 = vmatmul.mubr.f32.gmra.mrb[70].mxu1 %v4503_v49  ;;  %v4513_v54 = vadd.f32 %v1428_v39, %v4311_v55 }
 0x4c9   :  { %v4510_v48 = vadd.f32 %v1423_v12, %v4308_v62  ;;  %v3268_v41 = vpop.f32.mrb[74].mxu0 }
 0x4ca   :  { %v1438_v57 = vadd.f32 %v3268_v41, %v4465_v56  ;;  %v1432_v51 = vpop.f32.mrb[75].mxu0 }
 0x4cb   :  { %v1433_v58 = vadd.f32 %v4465_v56, %v1432_v51  ;;  %3343 = vmatprep.mubr.f32.mxu1 %v4510_v48 }
 0x4cc   :  { %3344 = vmatmul.mubr.f32.gmra.mrb[72].mxu1 %v4513_v54  ;;  %v4523_v62 = vadd.f32 %v1438_v57, %v4321_v59 }
 0x4cd   :  { %v4520_v16 = vadd.f32 %v1433_v58, %v4318_v5  ;;  %v3271_v52 = vpop.f32.mrb[76].mxu0 }
 0x4ce   :  { %v1448_v40 = vadd.f32 %v3271_v52, %v4465_v56  ;;  %v1442_v55 = vpop.f32.mrb[77].mxu0 }
 0x4cf   :  { %v1443_v1 = vadd.f32 %v4465_v56, %v1442_v55  ;;  %3346 = vmatprep.mubr.f32.mxu1 %v4520_v16 }
 0x4d0   :  { %3347 = vmatmul.mubr.f32.gmra.mrb[74].mxu1 %v4523_v62  ;;  %v4533_v5 = vadd.f32 %v1448_v40, %v4331_v63 }
 0x4d1   :  { %v4530_v20 = vadd.f32 %v1443_v1, %v4328_v13  ;;  %v3274_v6 = vpop.f32.mrb[78].mxu0 }
 0x4d2   :  { %v1458_v9 = vadd.f32 %v3274_v6, %v4465_v56  ;;  %v1452_v59 = vpop.f32.mrb[79].mxu0 }
 0x4d3   :  { %v1453_v24 = vadd.f32 %v4465_v56, %v1452_v59  ;;  %3349 = vmatprep.mubr.f32.mxu1 %v4530_v20 }
 0x4d4   :  { %3350 = vmatmul.mubr.f32.gmra.mrb[76].mxu1 %v4533_v5  ;;  %v4543_v13 = vadd.f32 %v1458_v9, %v4341_v3 }
 0x4d5   :  { %v4540_v60 = vadd.f32 %v1453_v24, %v4338_v22  ;;  %v3277_v28 = vpop.f32.mrb[80].mxu0 }
 0x4d6   :  { %v1468_v29 = vadd.f32 %v3277_v28, %v4465_v56  ;;  %v1462_v63 = vpop.f32.mrb[81].mxu0 }
 0x4d7   :  { %v1463_v33 = vadd.f32 %v4465_v56, %v1462_v63  ;;  %3352 = vmatprep.mubr.f32.mxu1 %v4540_v60 }
 0x4d8   :  { %3353 = vmatmul.mubr.f32.gmra.mrb[78].mxu1 %v4543_v13  ;;  %v4553_v22 = vadd.f32 %v1468_v29, %v4351_v7 }
 0x4d9   :  { %v4550_v32 = vadd.f32 %v1463_v33, %v4348_v37  ;;  %v3280_v35 = vpop.f32.mrb[82].mxu0 }
 0x4da   :  { %v1478_v36 = vadd.f32 %v3280_v35, %v4465_v56  ;;  %v1472_v3 = vpop.f32.mrb[83].mxu0 }
 0x4db   :  { %v1473_v30 = vadd.f32 %v4465_v56, %v1472_v3  ;;  %3355 = vmatprep.mubr.f32.mxu1 %v4550_v32 }
 0x4dc   :  { %3356 = vmatmul.mubr.f32.gmra.mrb[80].mxu1 %v4553_v22  ;;  %v4563_v37 = vadd.f32 %v1478_v36, %v4361_v11  ;;  %v2206_v36 = vld [vmem:[#allocation11 + $0x10] sm:$0xff] }
 0x4dd   :  { %v4560_v45 = vadd.f32 %v1473_v30, %v4358_v46  ;;  %v3283_v44 = vpop.f32.mrb[84].mxu0  ;;  %v2207_v30 = vld [vmem:[#allocation11 + $0x18] sm:$0xff] }
 0x4de   :  { %v1488_v14 = vadd.f32 %v3283_v44, %v4465_v56  ;;  %v1482_v7 = vpop.f32.mrb[85].mxu0  ;;  %v2208_v44 = vld [vmem:[#allocation11 + $0x20] sm:$0xff] }
 0x4df   :  { %v1483_v43 = vadd.f32 %v4465_v56, %v1482_v7  ;;  %3358 = vmatprep.mubr.f32.mxu1 %v4560_v45  ;;  %v2210_v7 = vld [vmem:[#allocation11 + $0x30] sm:$0xff] }
 0x4e0   :  { %3359 = vmatmul.mubr.f32.gmra.mrb[82].mxu1 %v4563_v37  ;;  %v4573_v46 = vadd.f32 %v1488_v14, %v4371_v15  ;;  %v2209_v14 = vld [vmem:[#allocation11 + $0x28] sm:$0xff] }
 0x4e1   :  { %v4570_v17 = vadd.f32 %v1483_v43, %v4368_v25  ;;  %v3286_v53 = vpop.f32.mrb[86].mxu0  ;;  %v2211_v43 = vld [vmem:[#allocation11 + $0x38] sm:$0xff] }
 0x4e2   :  { %v1498_v39 = vadd.f32 %v3286_v53, %v4465_v56  ;;  %v1492_v11 = vpop.f32.mrb[87].mxu0  ;;  %v2212_v53 = vld [vmem:[#allocation11 + $0x40] sm:$0xff] }
 0x4e3   :  { %v1493_v47 = vadd.f32 %v4465_v56, %v1492_v11  ;;  %3361 = vmatprep.mubr.f32.mxu1 %v4570_v17 }
 0x4e4   :  { %3362 = vmatmul.mubr.f32.gmra.mrb[84].mxu1 %v4573_v46  ;;  %v4583_v25 = vadd.f32 %v1498_v39, %v4381_v19  ;;  %v2213_v39 = vld [vmem:[#allocation11 + $0x48] sm:$0xff] }
 0x4e5   :  { %v4580_v12 = vadd.f32 %v1493_v47, %v4378_v61  ;;  %v3289_v41 = vpop.f32.mrb[88].mxu0  ;;  %v3779_v11 = vpack.c.bf16 %v2213_v39, %v2212_v53  ;;  %v2214_v47 = vld [vmem:[#allocation11 + $0x50] sm:$0xff] }
 0x4e6   :  { %v1508_v57 = vadd.f32 %v3289_v41, %v4465_v56  ;;  %v1502_v15 = vpop.f32.mrb[89].mxu0  ;;  %v2215_v41 = vld [vmem:[#allocation11 + $0x58] sm:$0xff] }
 0x4e7   :  { %v1503_v51 = vadd.f32 %v4465_v56, %v1502_v15  ;;  %3364 = vmatprep.mubr.f32.mxu1 %v4580_v12  ;;  %v2216_v15 = vld [vmem:[#allocation11 + $0x60] sm:$0xff] }
 0x4e8   :  { %3365 = vmatmul.mubr.f32.gmra.mrb[86].mxu1 %v4583_v25  ;;  %v4593_v61 = vadd.f32 %v1508_v57, %v4391_v23  ;;  %v3783_v57 = vpack.c.bf16 %v2215_v41, %v2214_v47 }
 0x4e9   :  { %v4590_v58 = vadd.f32 %v1503_v51, %v4388_v2  ;;  %v3292_v52 = vpop.f32.mrb[90].mxu0  ;;  %v2217_v51 = vld [vmem:[#allocation11 + $0x68] sm:$0xff] }
 0x4ea   :  { %v1518_v40 = vadd.f32 %v3292_v52, %v4465_v56  ;;  %v1512_v19 = vpop.f32.mrb[91].mxu0  ;;  %v3787_v52 = vpack.c.bf16 %v2217_v51, %v2216_v15 }
 0x4eb   :  { %v1513_v55 = vadd.f32 %v4465_v56, %v1512_v19  ;;  %3367 = vmatprep.mubr.f32.mxu1 %v4590_v58 }
 0x4ec   :  { %3368 = vmatmul.mubr.f32.gmra.mrb[88].mxu1 %v4593_v61  ;;  %v4603_v2 = vadd.f32 %v1518_v40, %v4401_v27  ;;  %v4630_v40 = vld [vmem:[%s4789_s4 + $0x2] ss:$0 sm:$0xff] }
 0x4ed   :  { %v4600_v1 = vadd.f32 %v1513_v55, %v4398_v10  ;;  %v3295_v6 = vpop.f32.mrb[92].mxu0 }
 0x4ee   :  { %v1528_v9 = vadd.f32 %v3295_v6, %v4465_v56  ;;  %v1522_v23 = vpop.f32.mrb[93].mxu0 }
 0x4ef   :  { %v1523_v59 = vadd.f32 %v4465_v56, %v1522_v23  ;;  %3370 = vmatprep.mubr.f32.mxu1 %v4600_v1 }
 0x4f0   :  { %3371 = vmatmul.mubr.f32.gmra.mrb[90].mxu1 %v4603_v2  ;;  %v4613_v10 = vadd.f32 %v1528_v9, %v4411_v31  ;;  %v2205_v31 = vld [vmem:[#allocation11 + $0x8] sm:$0xff] }
 0x4f1   :  { %v4610_v24 = vadd.f32 %v1523_v59, %v4408_v21  ;;  %v3298_v28 = vpop.f32.mrb[94].mxu0  ;;  %v2204_v21 = vld [vmem:[#allocation11] sm:$0xff] }
 0x4f2   :  { %v1538_v29 = vadd.f32 %v3298_v28, %v4465_v56  ;;  %v1532_v27 = vpop.f32.mrb[95].mxu0  ;;  %v3763_v3 = vpack.c.bf16 %v2205_v31, %v2204_v21 }
 0x4f3   :  { %v1533_v63 = vadd.f32 %v4465_v56, %v1532_v27  ;;  %3373 = vmatprep.mubr.f32.mxu1 %v4610_v24  ;;  %v3767_v56 = vpack.c.bf16 %v2207_v30, %v2206_v36 }
 0x4f4   :  { %3374 = vmatmul.mubr.f32.gmra.mrb[92].mxu1 %v4613_v10  ;;  %v4623_v35 = vadd.f32 %v1538_v29, %v4421_v42  ;;  %3764 = vmatprep.subr.bf16.mxu1 %v3763_v3  ;;  %v3775_v42 = vpack.c.bf16 %v2211_v43, %v2210_v7 }
 0x4f5   :  { %v4620_v33 = vadd.f32 %v1533_v63, %v4418_v34  ;;  %3766 = vmatpush3.bf16.msra.mxu1 %v3763_v3  ;;  %v3771_v34 = vpack.c.bf16 %v2209_v14, %v2208_v44 }
 0x4f6   :  { %3768 = vmatprep.subr.bf16.mxu1 %v3767_v56 }
 0x4f7   :  { %3376 = vmatprep.mubr.f32.mxu1 %v4620_v33 }
 0x4f8   :  { %3377 = vmatmul.mubr.f32.gmra.mrb[94].mxu1 %v4623_v35 }
 0x4f9   :  { %3770 = vmatpush3.bf16.msra.mxu1 %v3767_v56 }
 0x4fa   :  { %3772 = vmatprep.subr.bf16.mxu1 %v3771_v34 }
 0x4fd   :  { %3774 = vmatpush3.bf16.msra.mxu1 %v3771_v34 }
 0x4fe   :  { %3776 = vmatprep.subr.bf16.mxu1 %v3775_v42 }
 0x501   :  { %3778 = vmatpush3.bf16.msra.mxu1 %v3775_v42 }
 0x502   :  { %3780 = vmatprep.subr.bf16.mxu1 %v3779_v11 }
 0x505   :  { %3782 = vmatpush3.bf16.msra.mxu1 %v3779_v11 }
 0x506   :  { %3784 = vmatprep.subr.bf16.mxu1 %v3783_v57 }
 0x509   :  { %3786 = vmatpush3.bf16.msra.mxu1 %v3783_v57 }
 0x50a   :  { %3788 = vmatprep.subr.bf16.mxu1 %v3787_v52 }
 0x50d   :  { %3790 = vmatpush3.bf16.msra.mxu1 %v3787_v52 }
 0x58f   :  { %v3333_v19 = vpop.f32.mrb[64].mxu1 }
 0x590   :  { %v1670_v55 = vadd.f32 %v3333_v19, %v4630_v40  ;;  %v1664_v6 = vpop.f32.mrb[65].mxu1 }
 0x591   :  { %v1665_v9 = vadd.f32 %v4630_v40, %v1664_v6 }
 0x592   :  { %v1824_v28 = vmax.f32 %v1670_v55, 0.0 }
 0x593   :  { %v1823_v23 = vmax.f32 %v1665_v9, 0.0  ;;  %v3336_v59 = vpop.f32.mrb[66].mxu1 }
 0x594   :  { %v1680_v29 = vadd.f32 %v3336_v59, %v4630_v40  ;;  %v1674_v27 = vpop.f32.mrb[67].mxu1 }
 0x595   :  { %v1675_v63 = vadd.f32 %v4630_v40, %v1674_v27  ;;  %3411 = vmatprep.mubr.f32.mxu0 %v1823_v23 }
 0x596   :  { %3412 = vmatmul.mubr.f32.vlgmr.msra.gmra.mrb[96].mxu0 %v1824_v28  ;;  %v1826_v36 = vmax.f32 %v1680_v29, 0.0 }
 0x597   :  { %v1825_v21 = vmax.f32 %v1675_v63, 0.0  ;;  %v3339_v31 = vpop.f32.mrb[68].mxu1 }
 0x598   :  { %v1690_v3 = vadd.f32 %v3339_v31, %v4630_v40  ;;  %v1684_v30 = vpop.f32.mrb[69].mxu1 }
 0x599   :  { %v1685_v56 = vadd.f32 %v4630_v40, %v1684_v30  ;;  %3414 = vmatprep.mubr.f32.mxu0 %v1825_v21 }
 0x59a   :  { %3415 = vmatmul.mubr.f32.gmra.mrb[98].mxu0 %v1826_v36  ;;  %v1828_v34 = vmax.f32 %v1690_v3, 0.0 }
 0x59b   :  { %v1827_v44 = vmax.f32 %v1685_v56, 0.0  ;;  %v3342_v14 = vpop.f32.mrb[70].mxu1 }
 0x59c   :  { %v1700_v7 = vadd.f32 %v3342_v14, %v4630_v40  ;;  %v1694_v43 = vpop.f32.mrb[71].mxu1 }
 0x59d   :  { %v1695_v42 = vadd.f32 %v4630_v40, %v1694_v43  ;;  %3417 = vmatprep.mubr.f32.mxu0 %v1827_v44 }
 0x59e   :  { %3418 = vmatmul.mubr.f32.gmra.mrb[100].mxu0 %v1828_v34  ;;  %v1830_v11 = vmax.f32 %v1700_v7, 0.0 }
 0x59f   :  { %v1829_v53 = vmax.f32 %v1695_v42, 0.0  ;;  %v3345_v39 = vpop.f32.mrb[72].mxu1 }
 0x5a0   :  { %v1710_v47 = vadd.f32 %v3345_v39, %v4630_v40  ;;  %v1704_v41 = vpop.f32.mrb[73].mxu1 }
 0x5a1   :  { %v1705_v57 = vadd.f32 %v4630_v40, %v1704_v41  ;;  %3420 = vmatprep.mubr.f32.mxu0 %v1829_v53 }
 0x5a2   :  { %3421 = vmatmul.mubr.f32.gmra.mrb[102].mxu0 %v1830_v11  ;;  %v1832_v52 = vmax.f32 %v1710_v47, 0.0 }
 0x5a3   :  { %v1831_v15 = vmax.f32 %v1705_v57, 0.0  ;;  %v3348_v51 = vpop.f32.mrb[74].mxu1 }
 0x5a4   :  { %v1720_v19 = vadd.f32 %v3348_v51, %v4630_v40  ;;  %v1714_v55 = vpop.f32.mrb[75].mxu1 }
 0x5a5   :  { %v1715_v6 = vadd.f32 %v4630_v40, %v1714_v55  ;;  %3423 = vmatprep.mubr.f32.mxu0 %v1831_v15 }
 0x5a6   :  { %3424 = vmatmul.mubr.f32.gmra.mrb[104].mxu0 %v1832_v52  ;;  %v1834_v59 = vmax.f32 %v1720_v19, 0.0 }
 0x5a7   :  { %v1833_v9 = vmax.f32 %v1715_v6, 0.0  ;;  %v3351_v23 = vpop.f32.mrb[76].mxu1 }
 0x5a8   :  { %v1730_v28 = vadd.f32 %v3351_v23, %v4630_v40  ;;  %v1724_v29 = vpop.f32.mrb[77].mxu1 }
 0x5a9   :  { %v1725_v27 = vadd.f32 %v4630_v40, %v1724_v29  ;;  %3426 = vmatprep.mubr.f32.mxu0 %v1833_v9 }
 0x5aa   :  { %3427 = vmatmul.mubr.f32.gmra.mrb[106].mxu0 %v1834_v59  ;;  %v1836_v31 = vmax.f32 %v1730_v28, 0.0 }
 0x5ab   :  { %v1835_v63 = vmax.f32 %v1725_v27, 0.0  ;;  %v3354_v21 = vpop.f32.mrb[78].mxu1 }
 0x5ac   :  { %v1740_v36 = vadd.f32 %v3354_v21, %v4630_v40  ;;  %v1734_v3 = vpop.f32.mrb[79].mxu1 }
 0x5ad   :  { %v1735_v30 = vadd.f32 %v4630_v40, %v1734_v3  ;;  %3429 = vmatprep.mubr.f32.mxu0 %v1835_v63 }
 0x5ae   :  { %3430 = vmatmul.mubr.f32.gmra.mrb[108].mxu0 %v1836_v31  ;;  %v1838_v14 = vmax.f32 %v1740_v36, 0.0 }
 0x5af   :  { %v1837_v56 = vmax.f32 %v1735_v30, 0.0  ;;  %v3357_v44 = vpop.f32.mrb[80].mxu1 }
 0x5b0   :  { %v1750_v34 = vadd.f32 %v3357_v44, %v4630_v40  ;;  %v1744_v7 = vpop.f32.mrb[81].mxu1 }
 0x5b1   :  { %v1745_v43 = vadd.f32 %v4630_v40, %v1744_v7  ;;  %3432 = vmatprep.mubr.f32.mxu0 %v1837_v56 }
 0x5b2   :  { %3433 = vmatmul.mubr.f32.gmra.mrb[110].mxu0 %v1838_v14  ;;  %v1840_v39 = vmax.f32 %v1750_v34, 0.0 }
 0x5b3   :  { %v1839_v42 = vmax.f32 %v1745_v43, 0.0  ;;  %v3360_v53 = vpop.f32.mrb[82].mxu1 }
 0x5b4   :  { %v1760_v11 = vadd.f32 %v3360_v53, %v4630_v40  ;;  %v1754_v47 = vpop.f32.mrb[83].mxu1 }
 0x5b5   :  { %v1755_v41 = vadd.f32 %v4630_v40, %v1754_v47  ;;  %3435 = vmatprep.mubr.f32.mxu0 %v1839_v42 }
 0x5b6   :  { %3436 = vmatmul.mubr.f32.gmra.mrb[112].mxu0 %v1840_v39  ;;  %v1842_v51 = vmax.f32 %v1760_v11, 0.0 }
 0x5b7   :  { %v1841_v57 = vmax.f32 %v1755_v41, 0.0  ;;  %v3363_v15 = vpop.f32.mrb[84].mxu1 }
 0x5b8   :  { %v1770_v52 = vadd.f32 %v3363_v15, %v4630_v40  ;;  %v1764_v19 = vpop.f32.mrb[85].mxu1 }
 0x5b9   :  { %v1765_v55 = vadd.f32 %v4630_v40, %v1764_v19  ;;  %3438 = vmatprep.mubr.f32.mxu0 %v1841_v57 }
 0x5ba   :  { %3439 = vmatmul.mubr.f32.gmra.mrb[114].mxu0 %v1842_v51  ;;  %v1844_v23 = vmax.f32 %v1770_v52, 0.0 }
 0x5bb   :  { %v1843_v6 = vmax.f32 %v1765_v55, 0.0  ;;  %v3366_v9 = vpop.f32.mrb[86].mxu1 }
 0x5bc   :  { %v1780_v59 = vadd.f32 %v3366_v9, %v4630_v40  ;;  %v1774_v28 = vpop.f32.mrb[87].mxu1  ;;  %v2218_v9 = vld [vmem:[#allocation11 + $0x70] sm:$0xff] }
 0x5bd   :  { %v1775_v29 = vadd.f32 %v4630_v40, %v1774_v28  ;;  %3441 = vmatprep.mubr.f32.mxu0 %v1843_v6  ;;  %v4667_v28 = vld [vmem:[%s4791_s6 + $0x2] ss:$0 sm:$0xff] }
 0x5be   :  { %3442 = vmatmul.mubr.f32.gmra.mrb[116].mxu0 %v1844_v23  ;;  %v1846_v21 = vmax.f32 %v1780_v59, 0.0  ;;  %v2219_v23 = vld [vmem:[#allocation11 + $0x78] sm:$0xff] }
 0x5bf   :  { %v1845_v27 = vmax.f32 %v1775_v29, 0.0  ;;  %v3369_v63 = vpop.f32.mrb[88].mxu1  ;;  %v3791_v59 = vpack.c.bf16 %v2219_v23, %v2218_v9 }
 0x5c0   :  { %v1790_v31 = vadd.f32 %v3369_v63, %v4630_v40  ;;  %v1784_v36 = vpop.f32.mrb[89].mxu1 }
 0x5c1   :  { %v1785_v3 = vadd.f32 %v4630_v40, %v1784_v36  ;;  %3444 = vmatprep.mubr.f32.mxu0 %v1845_v27  ;;  %3792 = vmatprep.subr.bf16.mxu1 %v3791_v59 }
 0x5c2   :  { %3445 = vmatmul.mubr.f32.gmra.mrb[118].mxu0 %v1846_v21  ;;  %v1848_v44 = vmax.f32 %v1790_v31, 0.0  ;;  %3794 = vmatpush3.bf16.msra.mxu1 %v3791_v59 }
 0x5c3   :  { %v1847_v30 = vmax.f32 %v1785_v3, 0.0  ;;  %v3372_v56 = vpop.f32.mrb[90].mxu1 }
 0x5c4   :  { %v1800_v14 = vadd.f32 %v3372_v56, %v4630_v40  ;;  %v1794_v34 = vpop.f32.mrb[91].mxu1 }
 0x5c5   :  { %v1795_v7 = vadd.f32 %v4630_v40, %v1794_v34  ;;  %3447 = vmatprep.mubr.f32.mxu0 %v1847_v30 }
 0x5c6   :  { %3448 = vmatmul.mubr.f32.gmra.mrb[120].mxu0 %v1848_v44  ;;  %v1850_v53 = vmax.f32 %v1800_v14, 0.0 }
 0x5c7   :  { %v1849_v43 = vmax.f32 %v1795_v7, 0.0  ;;  %v3375_v42 = vpop.f32.mrb[92].mxu1 }
 0x5c8   :  { %v1810_v39 = vadd.f32 %v3375_v42, %v4630_v40  ;;  %v1804_v11 = vpop.f32.mrb[93].mxu1 }
 0x5c9   :  { %v1805_v47 = vadd.f32 %v4630_v40, %v1804_v11  ;;  %3450 = vmatprep.mubr.f32.mxu0 %v1849_v43 }
 0x5ca   :  { %3451 = vmatmul.mubr.f32.gmra.mrb[122].mxu0 %v1850_v53  ;;  %v1852_v15 = vmax.f32 %v1810_v39, 0.0 }
 0x5cb   :  { %v1851_v41 = vmax.f32 %v1805_v47, 0.0  ;;  %v3378_v57 = vpop.f32.mrb[94].mxu1 }
 0x5cc   :  { %v1820_v51 = vadd.f32 %v3378_v57, %v4630_v40  ;;  %v1814_v52 = vpop.f32.mrb[95].mxu1 }
 0x5cd   :  { %v1815_v19 = vadd.f32 %v4630_v40, %v1814_v52  ;;  %3453 = vmatprep.mubr.f32.mxu0 %v1851_v41 }
 0x5ce   :  { %3454 = vmatmul.mubr.f32.gmra.mrb[124].mxu0 %v1852_v15  ;;  %v1854_v6 = vmax.f32 %v1820_v51, 0.0 }
 0x5cf   :  { %v1853_v55 = vmax.f32 %v1815_v19, 0.0 }
 0x5d1   :  { %3456 = vmatprep.mubr.f32.mxu0 %v1853_v55 }
 0x5d2   :  { %3457 = vmatmul.mubr.f32.gmra.mrb[126].mxu0 %v1854_v6 }
 0x669   :  { %v3413_v29 = vpop.f32.mrb[96].mxu0 }
 0x66a   :  { %v1952_v27 = vadd.f32 %v3413_v29, %v4667_v28  ;;  %v1946_v40 = vpop.f32.mrb[97].mxu0 }
 0x66b   :  { %v1947_v63 = vadd.f32 %v4667_v28, %v1946_v40 }
 0x66c   :  { %v2106_v21 = vadd.f32 %v1952_v27, %v4473_v0 }
 0x66d   :  { %v2105_v31 = vadd.f32 %v1947_v63, %v4470_v18  ;;  %v3416_v36 = vpop.f32.mrb[98].mxu0 }
 0x66e   :  { %v1962_v3 = vadd.f32 %v3416_v36, %v4667_v28  ;;  %v1956_v30 = vpop.f32.mrb[99].mxu0  ;;  %v2173_v14 = vmax.f32 %v2106_v21, 0.0 }
 0x66f   :  { %v2172_v56 = vmax.f32 %v2105_v31, 0.0  ;;  %v1957_v44 = vadd.f32 %v4667_v28, %v1956_v30 }
 0x670   :  { %v2108_v34 = vadd.f32 %v1962_v3, %v4483_v26 }
 0x671   :  { %v2107_v7 = vadd.f32 %v1957_v44, %v4480_v4  ;;  %v3419_v43 = vpop.f32.mrb[100].mxu0  ;;  %3491 = vmatprep.mubr.f32.mxu1 %v2172_v56 }
 0x672   :  { %v1972_v42 = vadd.f32 %v3419_v43, %v4667_v28  ;;  %v1966_v53 = vpop.f32.mrb[101].mxu0  ;;  %3492 = vmatmul.mubr.f32.vlgmr.msra.gmra.mrb[96].mxu1 %v2173_v14  ;;  %v2175_v39 = vmax.f32 %v2108_v34, 0.0 }
 0x673   :  { %v2174_v0 = vmax.f32 %v2107_v7, 0.0  ;;  %v1967_v18 = vadd.f32 %v4667_v28, %v1966_v53 }
 0x674   :  { %v2110_v11 = vadd.f32 %v1972_v42, %v4493_v38 }
 0x675   :  { %v2109_v47 = vadd.f32 %v1967_v18, %v4490_v8  ;;  %v3422_v41 = vpop.f32.mrb[102].mxu0  ;;  %3494 = vmatprep.mubr.f32.mxu1 %v2174_v0 }
 0x676   :  { %v1982_v26 = vadd.f32 %v3422_v41, %v4667_v28  ;;  %v1976_v57 = vpop.f32.mrb[103].mxu0  ;;  %3495 = vmatmul.mubr.f32.gmra.mrb[98].mxu1 %v2175_v39  ;;  %v2177_v51 = vmax.f32 %v2110_v11, 0.0 }
 0x677   :  { %v2176_v4 = vmax.f32 %v2109_v47, 0.0  ;;  %v1977_v15 = vadd.f32 %v4667_v28, %v1976_v57 }
 0x678   :  { %v2112_v52 = vadd.f32 %v1982_v26, %v4503_v49 }
 0x679   :  { %v2111_v19 = vadd.f32 %v1977_v15, %v4500_v50  ;;  %v3425_v55 = vpop.f32.mrb[104].mxu0  ;;  %3497 = vmatprep.mubr.f32.mxu1 %v2176_v4 }
 0x67a   :  { %v1992_v38 = vadd.f32 %v3425_v55, %v4667_v28  ;;  %v1986_v6 = vpop.f32.mrb[105].mxu0  ;;  %3498 = vmatmul.mubr.f32.gmra.mrb[100].mxu1 %v2177_v51  ;;  %v2179_v23 = vmax.f32 %v2112_v52, 0.0 }
 0x67b   :  { %v2178_v8 = vmax.f32 %v2111_v19, 0.0  ;;  %v1987_v9 = vadd.f32 %v4667_v28, %v1986_v6 }
 0x67c   :  { %v2114_v59 = vadd.f32 %v1992_v38, %v4513_v54 }
 0x67d   :  { %v2113_v29 = vadd.f32 %v1987_v9, %v4510_v48  ;;  %v3428_v27 = vpop.f32.mrb[106].mxu0  ;;  %3500 = vmatprep.mubr.f32.mxu1 %v2178_v8 }
 0x67e   :  { %v2002_v49 = vadd.f32 %v3428_v27, %v4667_v28  ;;  %v1996_v40 = vpop.f32.mrb[107].mxu0  ;;  %3501 = vmatmul.mubr.f32.gmra.mrb[102].mxu1 %v2179_v23  ;;  %v2181_v21 = vmax.f32 %v2114_v59, 0.0 }
 0x67f   :  { %v2180_v50 = vmax.f32 %v2113_v29, 0.0  ;;  %v1997_v63 = vadd.f32 %v4667_v28, %v1996_v40 }
 0x680   :  { %v2116_v31 = vadd.f32 %v2002_v49, %v4523_v62 }
 0x681   :  { %v2115_v36 = vadd.f32 %v1997_v63, %v4520_v16  ;;  %v3431_v3 = vpop.f32.mrb[108].mxu0  ;;  %3503 = vmatprep.mubr.f32.mxu1 %v2180_v50 }
 0x682   :  { %v2012_v54 = vadd.f32 %v3431_v3, %v4667_v28  ;;  %v2006_v30 = vpop.f32.mrb[109].mxu0  ;;  %3504 = vmatmul.mubr.f32.gmra.mrb[104].mxu1 %v2181_v21  ;;  %v2183_v44 = vmax.f32 %v2116_v31, 0.0 }
 0x683   :  { %v2182_v48 = vmax.f32 %v2115_v36, 0.0  ;;  %v2007_v56 = vadd.f32 %v4667_v28, %v2006_v30 }
 0x684   :  { %v2118_v14 = vadd.f32 %v2012_v54, %v4533_v5 }
 0x685   :  { %v2117_v34 = vadd.f32 %v2007_v56, %v4530_v20  ;;  %v3434_v7 = vpop.f32.mrb[110].mxu0  ;;  %3506 = vmatprep.mubr.f32.mxu1 %v2182_v48 }
 0x686   :  { %v2022_v62 = vadd.f32 %v3434_v7, %v4667_v28  ;;  %v2016_v43 = vpop.f32.mrb[111].mxu0  ;;  %3507 = vmatmul.mubr.f32.gmra.mrb[106].mxu1 %v2183_v44  ;;  %v2185_v53 = vmax.f32 %v2118_v14, 0.0 }
 0x687   :  { %v2184_v16 = vmax.f32 %v2117_v34, 0.0  ;;  %v2017_v42 = vadd.f32 %v4667_v28, %v2016_v43 }
 0x688   :  { %v2120_v0 = vadd.f32 %v2022_v62, %v4543_v13 }
 0x689   :  { %v2119_v18 = vadd.f32 %v2017_v42, %v4540_v60  ;;  %v3437_v39 = vpop.f32.mrb[112].mxu0  ;;  %3509 = vmatprep.mubr.f32.mxu1 %v2184_v16 }
 0x68a   :  { %v2032_v5 = vadd.f32 %v3437_v39, %v4667_v28  ;;  %v2026_v11 = vpop.f32.mrb[113].mxu0  ;;  %3510 = vmatmul.mubr.f32.gmra.mrb[108].mxu1 %v2185_v53  ;;  %v2187_v41 = vmax.f32 %v2120_v0, 0.0 }
 0x68b   :  { %v2186_v20 = vmax.f32 %v2119_v18, 0.0  ;;  %v2027_v47 = vadd.f32 %v4667_v28, %v2026_v11 }
 0x68c   :  { %v2122_v26 = vadd.f32 %v2032_v5, %v4553_v22 }
 0x68d   :  { %v2121_v57 = vadd.f32 %v2027_v47, %v4550_v32  ;;  %v3440_v4 = vpop.f32.mrb[114].mxu0  ;;  %3512 = vmatprep.mubr.f32.mxu1 %v2186_v20 }
 0x68e   :  { %v2042_v13 = vadd.f32 %v3440_v4, %v4667_v28  ;;  %v2036_v15 = vpop.f32.mrb[115].mxu0  ;;  %3513 = vmatmul.mubr.f32.gmra.mrb[110].mxu1 %v2187_v41  ;;  %v2189_v52 = vmax.f32 %v2122_v26, 0.0 }
 0x68f   :  { %v2188_v60 = vmax.f32 %v2121_v57, 0.0  ;;  %v2037_v51 = vadd.f32 %v4667_v28, %v2036_v15 }
 0x690   :  { %v2124_v19 = vadd.f32 %v2042_v13, %v4563_v37 }
 0x691   :  { %v2123_v55 = vadd.f32 %v2037_v51, %v4560_v45  ;;  %v3443_v38 = vpop.f32.mrb[116].mxu0  ;;  %3515 = vmatprep.mubr.f32.mxu1 %v2188_v60 }
 0x692   :  { %v2052_v22 = vadd.f32 %v3443_v38, %v4667_v28  ;;  %v2046_v6 = vpop.f32.mrb[117].mxu0  ;;  %3516 = vmatmul.mubr.f32.gmra.mrb[112].mxu1 %v2189_v52  ;;  %v2191_v9 = vmax.f32 %v2124_v19, 0.0 }
 0x693   :  { %v2190_v32 = vmax.f32 %v2123_v55, 0.0  ;;  %v2047_v8 = vadd.f32 %v4667_v28, %v2046_v6 }
 0x694   :  { %v2126_v23 = vadd.f32 %v2052_v22, %v4573_v46 }
 0x695   :  { %v2125_v59 = vadd.f32 %v2047_v8, %v4570_v17  ;;  %v3446_v29 = vpop.f32.mrb[118].mxu0  ;;  %3518 = vmatprep.mubr.f32.mxu1 %v2190_v32 }
 0x696   :  { %v2062_v37 = vadd.f32 %v3446_v29, %v4667_v28  ;;  %v2056_v27 = vpop.f32.mrb[119].mxu0  ;;  %3519 = vmatmul.mubr.f32.gmra.mrb[114].mxu1 %v2191_v9  ;;  %v2193_v40 = vmax.f32 %v2126_v23, 0.0 }
 0x697   :  { %v2192_v45 = vmax.f32 %v2125_v59, 0.0  ;;  %v2057_v49 = vadd.f32 %v4667_v28, %v2056_v27 }
 0x698   :  { %v2128_v50 = vadd.f32 %v2062_v37, %v4583_v25 }
 0x699   :  { %v2127_v63 = vadd.f32 %v2057_v49, %v4580_v12  ;;  %v3449_v21 = vpop.f32.mrb[120].mxu0  ;;  %3521 = vmatprep.mubr.f32.mxu1 %v2192_v45 }
 0x69a   :  { %v2072_v46 = vadd.f32 %v3449_v21, %v4667_v28  ;;  %v2066_v31 = vpop.f32.mrb[121].mxu0  ;;  %3522 = vmatmul.mubr.f32.gmra.mrb[116].mxu1 %v2193_v40  ;;  %v2195_v3 = vmax.f32 %v2128_v50, 0.0 }
 0x69b   :  { %v2194_v17 = vmax.f32 %v2127_v63, 0.0  ;;  %v2067_v36 = vadd.f32 %v4667_v28, %v2066_v31 }
 0x69c   :  { %v2130_v54 = vadd.f32 %v2072_v46, %v4593_v61 }
 0x69d   :  { %v2129_v30 = vadd.f32 %v2067_v36, %v4590_v58  ;;  %v3452_v48 = vpop.f32.mrb[122].mxu0  ;;  %3524 = vmatprep.mubr.f32.mxu1 %v2194_v17 }
 0x69e   :  { %v2082_v25 = vadd.f32 %v3452_v48, %v4667_v28  ;;  %v2076_v56 = vpop.f32.mrb[123].mxu0  ;;  %3525 = vmatmul.mubr.f32.gmra.mrb[118].mxu1 %v2195_v3  ;;  %v2197_v14 = vmax.f32 %v2130_v54, 0.0 }
 0x69f   :  { %v2196_v12 = vmax.f32 %v2129_v30, 0.0  ;;  %v2077_v44 = vadd.f32 %v4667_v28, %v2076_v56 }
 0x6a0   :  { %v2132_v34 = vadd.f32 %v2082_v25, %v4603_v2 }
 0x6a1   :  { %v2131_v7 = vadd.f32 %v2077_v44, %v4600_v1  ;;  %v3455_v62 = vpop.f32.mrb[124].mxu0  ;;  %3527 = vmatprep.mubr.f32.mxu1 %v2196_v12 }
 0x6a2   :  { %v2092_v61 = vadd.f32 %v3455_v62, %v4667_v28  ;;  %v2086_v43 = vpop.f32.mrb[125].mxu0  ;;  %3528 = vmatmul.mubr.f32.gmra.mrb[120].mxu1 %v2197_v14  ;;  %v2199_v42 = vmax.f32 %v2132_v34, 0.0 }
 0x6a3   :  { %v2198_v58 = vmax.f32 %v2131_v7, 0.0  ;;  %v2087_v16 = vadd.f32 %v4667_v28, %v2086_v43 }
 0x6a4   :  { %v2134_v53 = vadd.f32 %v2092_v61, %v4613_v10 }
 0x6a5   :  { %v2133_v0 = vadd.f32 %v2087_v16, %v4610_v24  ;;  %v3458_v18 = vpop.f32.mrb[126].mxu0  ;;  %3530 = vmatprep.mubr.f32.mxu1 %v2198_v58  ;;  %v4736_v24 = vld [vmem:[%s4793_s8] ss:$0 sm:$0xff]  ;;  %s3950_s8 = smov [#allocation12]  }
 0x6a6   :  { %v2102_v2 = vadd.f32 %v3458_v18, %v4667_v28  ;;  %v2096_v39 = vpop.f32.mrb[127].mxu0  ;;  %3531 = vmatmul.mubr.f32.gmra.mrb[122].mxu1 %v2199_v42  ;;  %v2201_v11 = vmax.f32 %v2134_v53, 0.0  ;;  %s2489_s18 = sshll.u32 %s3950_s8, 4  ;;  %s2490_s18 = int_to_ptr.vmem [resolvable:$true] %s2489_s18 }
 0x6a7   :  { %v2200_v1 = vmax.f32 %v2133_v0, 0.0  ;;  %v2097_v5 = vadd.f32 %v4667_v28, %v2096_v39  ;;  %s3913_s19 = scalar_lea.vmem %s2490_s18, 4096  ;;  %p3918_p13 = scmp.lt.s32.totalorder %s2490_s18, %s2490_s18 }
 0x6a8   :  { %v2136_v20 = vadd.f32 %v2102_v2, %v4623_v35  ;;  %p3914_p12 = scmp.ne.s32.totalorder %s2490_s18, %s3913_s19  ;;  %p3919_p0 = scmp.lt.s32.totalorder %s3913_s19, %s3913_s19 }
 0x6a9   :  { %v2135_v47 = vadd.f32 %v2097_v5, %v4620_v33  ;;  %3533 = vmatprep.mubr.f32.mxu1 %v2200_v1 }
 0x6aa   :  { %3534 = vmatmul.mubr.f32.gmra.mrb[124].mxu1 %v2201_v11  ;;  %v2203_v10 = vmax.f32 %v2136_v20, 0.0  ;;  %p3920_p1 = por %p3919_p0, %p3918_p13 }
 0x6ab   :  { %v2202_v41 = vmax.f32 %v2135_v47, 0.0 }
 0x6ac   :  { %p3921_p2 = pnand %p3920_p1, %p3914_p12 }
 0x6ad   :  { %3536 = vmatprep.mubr.f32.mxu1 %v2202_v41 }
 0x6ae   :  { %3537 = vmatmul.mubr.f32.gmra.mrb[126].mxu1 %v2203_v10 }
 0x745   :  { %v3493_v26 = vpop.f32.mrb[96].mxu1 }
 0x746   :  { %v2299_v57 = vadd.f32 %v3493_v26, %v4736_v24  ;;  %v2293_v28 = vpop.f32.mrb[97].mxu1 }
 0x747   :  { %v2294_v4 = vadd.f32 %v4736_v24, %v2293_v28 }
 0x748   :  { %2453 = vst [vmem:[#allocation12 + $0x8] sm:$0xff] %v2299_v57 }
 0x749   :  { %2452 = vst [vmem:[#allocation12] sm:$0xff] %v2294_v4  ;;  %v3496_v33 = vpop.f32.mrb[98].mxu1 }
 0x74a   :  { %v2309_v35 = vadd.f32 %v3496_v33, %v4736_v24  ;;  %v2303_v13 = vpop.f32.mrb[99].mxu1 }
 0x74b   :  { %v2304_v15 = vadd.f32 %v4736_v24, %v2303_v13 }
 0x74c   :  { %2455 = vst [vmem:[#allocation12 + $0x18] sm:$0xff] %v2309_v35 }
 0x74d   :  { %2454 = vst [vmem:[#allocation12 + $0x10] sm:$0xff] %v2304_v15  ;;  %v3499_v60 = vpop.f32.mrb[100].mxu1 }
 0x74e   :  { %v2319_v51 = vadd.f32 %v3499_v60, %v4736_v24  ;;  %v2313_v52 = vpop.f32.mrb[101].mxu1 }
 0x74f   :  { %v2314_v19 = vadd.f32 %v4736_v24, %v2313_v52 }
 0x750   :  { %2457 = vst [vmem:[#allocation12 + $0x28] sm:$0xff] %v2319_v51 }
 0x751   :  { %2456 = vst [vmem:[#allocation12 + $0x20] sm:$0xff] %v2314_v19  ;;  %v3502_v55 = vpop.f32.mrb[102].mxu1 }
 0x752   :  { %v2329_v38 = vadd.f32 %v3502_v55, %v4736_v24  ;;  %v2323_v22 = vpop.f32.mrb[103].mxu1 }
 0x753   :  { %v2324_v6 = vadd.f32 %v4736_v24, %v2323_v22 }
 0x754   :  { %2459 = vst [vmem:[#allocation12 + $0x38] sm:$0xff] %v2329_v38 }
 0x755   :  { %2458 = vst [vmem:[#allocation12 + $0x30] sm:$0xff] %v2324_v6  ;;  %v3505_v32 = vpop.f32.mrb[104].mxu1 }
 0x756   :  { %v2339_v8 = vadd.f32 %v3505_v32, %v4736_v24  ;;  %v2333_v9 = vpop.f32.mrb[105].mxu1 }
 0x757   :  { %v2334_v23 = vadd.f32 %v4736_v24, %v2333_v9 }
 0x758   :  { %2461 = vst [vmem:[#allocation12 + $0x48] sm:$0xff] %v2339_v8 }
 0x759   :  { %2460 = vst [vmem:[#allocation12 + $0x40] sm:$0xff] %v2334_v23  ;;  %v3508_v59 = vpop.f32.mrb[106].mxu1 }
 0x75a   :  { %v2349_v29 = vadd.f32 %v3508_v59, %v4736_v24  ;;  %v2343_v37 = vpop.f32.mrb[107].mxu1 }
 0x75b   :  { %v2344_v27 = vadd.f32 %v4736_v24, %v2343_v37 }
 0x75c   :  { %2463 = vst [vmem:[#allocation12 + $0x58] sm:$0xff] %v2349_v29 }
 0x75d   :  { %2462 = vst [vmem:[#allocation12 + $0x50] sm:$0xff] %v2344_v27  ;;  %v3511_v45 = vpop.f32.mrb[108].mxu1 }
 0x75e   :  { %v2359_v49 = vadd.f32 %v3511_v45, %v4736_v24  ;;  %v2353_v40 = vpop.f32.mrb[109].mxu1 }
 0x75f   :  { %v2354_v50 = vadd.f32 %v4736_v24, %v2353_v40 }
 0x760   :  { %2465 = vst [vmem:[#allocation12 + $0x68] sm:$0xff] %v2359_v49 }
 0x761   :  { %2464 = vst [vmem:[#allocation12 + $0x60] sm:$0xff] %v2354_v50  ;;  %v3514_v63 = vpop.f32.mrb[110].mxu1 }
 0x762   :  { %v2369_v21 = vadd.f32 %v3514_v63, %v4736_v24  ;;  %v2363_v46 = vpop.f32.mrb[111].mxu1 }
 0x763   :  { %v2364_v31 = vadd.f32 %v4736_v24, %v2363_v46 }
 0x764   :  { %2467 = vst [vmem:[#allocation12 + $0x78] sm:$0xff] %v2369_v21 }
 0x765   :  { %2466 = vst [vmem:[#allocation12 + $0x70] sm:$0xff] %v2364_v31  ;;  %v3517_v17 = vpop.f32.mrb[112].mxu1 }
 0x766   :  { %v2379_v36 = vadd.f32 %v3517_v17, %v4736_v24  ;;  %v2373_v3 = vpop.f32.mrb[113].mxu1 }
 0x767   :  { %v2374_v54 = vadd.f32 %v4736_v24, %v2373_v3 }
 0x768   :  { %2469 = vst [vmem:[#allocation12 + $0x88] sm:$0xff] %v2379_v36 }
 0x769   :  { %2468 = vst [vmem:[#allocation12 + $0x80] sm:$0xff] %v2374_v54  ;;  %v3520_v30 = vpop.f32.mrb[114].mxu1 }
 0x76a   :  { %v2389_v48 = vadd.f32 %v3520_v30, %v4736_v24  ;;  %v2383_v25 = vpop.f32.mrb[115].mxu1 }
 0x76b   :  { %v2384_v56 = vadd.f32 %v4736_v24, %v2383_v25 }
 0x76c   :  { %2471 = vst [vmem:[#allocation12 + $0x98] sm:$0xff] %v2389_v48 }
 0x76d   :  { %2470 = vst [vmem:[#allocation12 + $0x90] sm:$0xff] %v2384_v56  ;;  %v3523_v12 = vpop.f32.mrb[116].mxu1 }
 0x76e   :  { %v2399_v44 = vadd.f32 %v3523_v12, %v4736_v24  ;;  %v2393_v14 = vpop.f32.mrb[117].mxu1 }
 0x76f   :  { %v2394_v34 = vadd.f32 %v4736_v24, %v2393_v14 }
 0x770   :  { %2473 = vst [vmem:[#allocation12 + $0xa8] sm:$0xff] %v2399_v44 }
 0x771   :  { %2472 = vst [vmem:[#allocation12 + $0xa0] sm:$0xff] %v2394_v34  ;;  %v3526_v7 = vpop.f32.mrb[118].mxu1 }
 0x772   :  { %v2409_v62 = vadd.f32 %v3526_v7, %v4736_v24  ;;  %v2403_v61 = vpop.f32.mrb[119].mxu1 }
 0x773   :  { %v2404_v43 = vadd.f32 %v4736_v24, %v2403_v61 }
 0x774   :  { %2475 = vst [vmem:[#allocation12 + $0xb8] sm:$0xff] %v2409_v62 }
 0x775   :  { %2474 = vst [vmem:[#allocation12 + $0xb0] sm:$0xff] %v2404_v43  ;;  %v3529_v58 = vpop.f32.mrb[120].mxu1 }
 0x776   :  { %v2419_v16 = vadd.f32 %v3529_v58, %v4736_v24  ;;  %v2413_v42 = vpop.f32.mrb[121].mxu1 }
 0x777   :  { %v2414_v53 = vadd.f32 %v4736_v24, %v2413_v42 }
 0x778   :  { %2477 = vst [vmem:[#allocation12 + $0xc8] sm:$0xff] %v2419_v16 }
 0x779   :  { %2476 = vst [vmem:[#allocation12 + $0xc0] sm:$0xff] %v2414_v53  ;;  %v3532_v0 = vpop.f32.mrb[122].mxu1 }
 0x77a   :  { %v2429_v18 = vadd.f32 %v3532_v0, %v4736_v24  ;;  %v2423_v2 = vpop.f32.mrb[123].mxu1 }
 0x77b   :  { %v2424_v39 = vadd.f32 %v4736_v24, %v2423_v2 }
 0x77c   :  { %2479 = vst [vmem:[#allocation12 + $0xd8] sm:$0xff] %v2429_v18 }
 0x77d   :  { %2478 = vst [vmem:[#allocation12 + $0xd0] sm:$0xff] %v2424_v39  ;;  %v3535_v1 = vpop.f32.mrb[124].mxu1 }
 0x77e   :  { %v2439_v5 = vadd.f32 %v3535_v1, %v4736_v24  ;;  %v2433_v11 = vpop.f32.mrb[125].mxu1 }
 0x77f   :  { %v2434_v20 = vadd.f32 %v4736_v24, %v2433_v11 }
 0x780   :  { %2481 = vst [vmem:[#allocation12 + $0xe8] sm:$0xff] %v2439_v5 }
 0x781   :  { %2480 = vst [vmem:[#allocation12 + $0xe0] sm:$0xff] %v2434_v20  ;;  %v3538_v47 = vpop.f32.mrb[126].mxu1 }
 0x782   :  { %v2449_v41 = vadd.f32 %v3538_v47, %v4736_v24  ;;  %v2443_v10 = vpop.f32.mrb[127].mxu1 }
 0x783   :  { %v2444_v26 = vadd.f32 %v4736_v24, %v2443_v10 }
 0x784   :  { %2483 = vst [vmem:[#allocation12 + $0xf8] sm:$0xff] %v2449_v41 }
 0x785   :  { %2482 = vst [vmem:[#allocation12 + $0xf0] sm:$0xff] %v2444_v26 }
 0x786   :  { %3924 = shalt.err (!%p3921_p2)
}
 0x787   :  { %s3925_s24 = scalar_lea.hbm %s4794_s9, 4096 }
 0x788   :  { %p3926_p3 = scmp.ne.s32.totalorder %s4794_s9, %s3925_s24  ;;  %p3929_p4 = scmp.lt.u32.totalorder %s3925_s24, %s4794_s9 }
 0x78a   :  { %p3931_p5 = pnand %p3929_p4, %p3926_p3 }
 0x78c   :  { %3934 = shalt.err (!%p3931_p5)
}
 0x78d   :  { %2495 = dma.vmem_to_hbm [thread:$0]  %s2490_s18, 4096, %s4794_s9, [#allocation5], %s3945_s21, %s3945_s21, %s3946_s22  }
 0x78e   :  { %3941 = dma.done.wait [#allocation5], 4096  }
 0x78f   :  { %3942 = vsyncadd [#allocation5], 4294963200 }
 0x790   :  { %2499 = vsyncpa [#allocation4], 1 }
 0x791   :  { %2500 = vsyncpa [#allocation7], 1 }
 0x792   :  { %2501 = vsyncpa [#allocation10], 1 }
 0x793   :  { %2502 = vsyncpa [#allocation5], 1 }

</bundles_post_ra>
